<compile_context>
chip_gen: v6e
topology: v6e:2x2x1
jax: 0.10.0
libtpu: 0.0.40
codegen_flags: <defaults>
</compile_context>

<pallas_src>
import math

import jax
import jax.numpy as jnp
from jax.experimental import pallas as pl
from jax.experimental.pallas import tpu as pltpu


def _round_up(v, m):
    return ((v + m - 1) // m) * m


def _pick_tile_rows(ho, wo):
    """Largest row-tile <= 32 that divides ho and keeps the output block
    sublane-aligned ((th*wo) % 8 == 0); falls back to the whole image."""
    if ho <= 4:
        return ho
    cap = min(32, max(2, ho // 2), ho)
    for th in range(cap, 0, -1):
        if ho % th == 0 and (th * wo) % 8 == 0:
            return th
    return ho


# ------------------------------ Pallas kernel ------------------------------ #
def down_block_kernel(x_e, x_o, w1_ref, b1_ref, w2_ref, b2_ref,
                      o_ref, y1_pad, acc1_ref, acc2_ref):
    """One (batch, row-tile) step of the fused DownBlock.

    x_e/x_o  : (1, TH+3, wo, 3*Cin) even / odd padded-input rows with conv1's
               three kw taps pre-packed along channels (bf16)
    w1_ref   : (3, 3*Cin, C1p)   conv1 weights, one K-packed group per kh (bf16)
    b1_ref   : (1, C1p)          conv1 bias (f32, zero-padded)
    w2_ref   : (3, 3*C1p, C2p)   conv2 weights, one K-packed group per kh (bf16)
    b2_ref   : (1, C2p)          conv2 bias (f32, zero-padded)
    o_ref    : (1, TH*wo, C2p)   output tile (bf16, lane-dense)
    y1_pad   : (TH+2, wo+2, C1p) bf16 VMEM scratch: conv1 rows + zero halo
    acc1_ref : ((TH+2)*wo, C1p)  f32 conv1 accumulator
    acc2_ref : (TH*wo, C2p)      f32 conv2 accumulator
    """
    th2, wop2, c1p = y1_pad.shape          # TH+2, wo+2, C1p
    th = th2 - 2
    wo = wop2 - 2
    c2p = o_ref.shape[2]
    k1 = w1_ref.shape[1]                   # 3*Cin
    m1 = th2 * wo
    m2 = th * wo

    t = pl.program_id(1)
    ho_total = pl.num_programs(1) * th

    # ---- conv1 (3x3, stride 2): 3 K-packed MXU matmuls, f32 VMEM accumulator
    slabs = (x_e[0], x_o[0])               # (TH+3, wo, 3*Cin) bf16 each
    for kh in range(3):
        win = slabs[kh % 2][kh // 2:kh // 2 + th2, :, :]
        part = jnp.dot(win.reshape(m1, k1), w1_ref[kh],
                       preferred_element_type=jnp.float32)
        if kh == 0:
            acc1_ref[...] = part
        else:
            acc1_ref[...] += part

    y1 = jnp.maximum(acc1_ref[...] + b1_ref[...], 0.0).reshape(th2, wo, c1p)

    # Rows outside the image (conv1 rows -1 and ho) are conv2's zero padding.
    row = (t * th - 1) + jax.lax.broadcasted_iota(jnp.int32, (th2, 1, 1), 0)
    y1 = jnp.where((row >= 0) & (row < ho_total), y1, 0.0).astype(y1_pad.dtype)

    # conv1 output (+ zero column halo) lives only in VMEM; no HBM round-trip.
    zcol = jnp.zeros((th2, 1, c1p), y1_pad.dtype)
    y1_pad[:, 0:1, :] = zcol
    y1_pad[:, wop2 - 1:wop2, :] = zcol
    y1_pad[:, 1:wo + 1, :] = y1

    # ---- conv2 (3x3 'same'): 3 K-packed (K = 3*C1p) MXU matmuls --------------
    for kh in range(3):
        win = jnp.concatenate(
            [y1_pad[kh:kh + th, kw:kw + wo, :] for kw in range(3)], axis=-1)
        part = jnp.dot(win.reshape(m2, 3 * c1p), w2_ref[kh],
                       preferred_element_type=jnp.float32)
        if kh == 0:
            acc2_ref[...] = part
        else:
            acc2_ref[...] += part

    o_ref[0] = jnp.maximum(acc2_ref[...] + b2_ref[...], 0.0).astype(o_ref.dtype)


# --------------------------------- wrapper --------------------------------- #
def _pack_w1(w_oihw, c1p, dtype):
    """torch OIHW (C1,Cin,3,3) -> (3, 3*Cin, c1p); row = kw*Cin + c within kh."""
    cout, cin, kh, kw = w_oihw.shape
    w = jnp.transpose(w_oihw, (2, 3, 1, 0))                    # (3, 3, Cin, C1)
    w = jnp.pad(w, ((0, 0), (0, 0), (0, 0), (0, c1p - cout)))
    return w.reshape(kh, kw * cin, c1p).astype(dtype)


def _pack_w2(w_oihw, c1p, c2p, dtype):
    """torch OIHW (C2,C1,3,3) -> (3, 3*c1p, c2p); row = kw*c1p + c within kh."""
    cout, cin, kh, kw = w_oihw.shape
    w = jnp.transpose(w_oihw, (2, 3, 1, 0))                    # (3, 3, C1, C2)
    w = jnp.pad(w, ((0, 0), (0, 0), (0, c1p - cin), (0, c2p - cout)))
    return w.reshape(kh, kw * c1p, c2p).astype(dtype)


@jax.jit
def down_block_forward(x_nchw, params):
    """Pallas-backed DownBlock forward. Module I/O layout: NCHW (PyTorch)."""
    x = jnp.transpose(x_nchw, (0, 2, 3, 1))                    # NCHW -> NHWC
    n, h, w, cin = x.shape
    c1 = params["b1"].shape[0]
    c2 = params["b2"].shape[0]
    c1p = _round_up(c1, 128)
    c2p = _round_up(c2, 128)
    ho = (h + 2 - 3) // 2 + 1
    wo = (w + 2 - 3) // 2 + 1
    th = _pick_tile_rows(ho, wo)
    n_tiles = ho // th
    m1 = (th + 2) * wo
    m2 = th * wo

    # Pad spatially, split into even/odd input rows and pre-pack conv1's three
    # kw taps into the channel dim: all in-kernel accesses become unit-stride
    # row slices and conv1's K dim becomes 3*cin.
    xp = jnp.pad(x, ((0, 0), (1, 1), (1, 1), (0, 0))).astype(jnp.bfloat16)

    def width_pack(row_parity):
        return jnp.concatenate(
            [xp[:, row_parity::2, kw:kw + 2 * wo - 1:2, :] for kw in range(3)],
            axis=-1)                                           # (n, rows, wo, 3*cin)

    def row_tile_slabs(xc):
        # tile t needs conv1 rows [t*th-1, t*th+th+1]  (1-row halo recomputed)
        rows = xc.shape[1]
        pad_bot = max(0, (ho + 3) - (rows + 1))
        xcp = jnp.pad(xc, ((0, 0), (1, pad_bot), (0, 0), (0, 0)))
        slabs = jnp.stack(
            [xcp[:, t * th:t * th + th + 3] for t in range(n_tiles)], axis=1)
        return slabs.reshape(n * n_tiles, th + 3, wo, 3 * cin)

    x_e = row_tile_slabs(width_pack(0))
    x_o = row_tile_slabs(width_pack(1))

    w1g = _pack_w1(params["w1"], c1p, jnp.bfloat16)            # (3, 3*cin, c1p)
    w2g = _pack_w2(params["w2"], c1p, c2p, jnp.bfloat16)       # (3, 3*c1p, c2p)
    b1g = jnp.pad(params["b1"], (0, c1p - c1)).reshape(1, c1p).astype(jnp.float32)
    b2g = jnp.pad(params["b2"], (0, c2p - c2)).reshape(1, c2p).astype(jnp.float32)

    slab_block = (1, th + 3, wo, 3 * cin)
    in_specs = [
        pl.BlockSpec(slab_block, lambda b, t: (b * n_tiles + t, 0, 0, 0)),
        pl.BlockSpec(slab_block, lambda b, t: (b * n_tiles + t, 0, 0, 0)),
        # weights / biases: batch- & tile-invariant index maps -> stay resident
        pl.BlockSpec(w1g.shape, lambda b, t: (0, 0, 0)),
        pl.BlockSpec(b1g.shape, lambda b, t: (0, 0)),
        pl.BlockSpec(w2g.shape, lambda b, t: (0, 0, 0)),
        pl.BlockSpec(b2g.shape, lambda b, t: (0, 0)),
    ]
    out_specs = pl.BlockSpec((1, m2, c2p), lambda b, t: (b, t, 0))

    # Explicit scoped-VMEM budget (double-buffered blocks + resident weights +
    # scratch + packed-K temporaries), clamped to fit v7x's 64 MiB VMEM.
    est = (2 * 2 * (th + 3) * wo * 3 * cin * 2          # input slabs x2 buffers
           + 2 * (w1g.size + w2g.size) * 2              # resident weights
           + 2 * (b1g.size + b2g.size) * 4
           + 2 * m2 * c2p * 2                           # output block x2 buffers
           + (th + 2) * (wo + 2) * c1p * 2              # y1 scratch (bf16)
           + m1 * c1p * 4 + m2 * c2p * 4                # f32 accumulators
           + m1 * 3 * cin * 2 + m2 * 3 * c1p * 2)       # packed-K LHS temporaries
    vmem_limit = int(min(max(2 * est, 32 << 20), 56 << 20))

    out = pl.pallas_call(
        down_block_kernel,
        out_shape=jax.ShapeDtypeStruct((n, ho * wo, c2p), jnp.bfloat16),
        grid=(n, n_tiles),
        in_specs=in_specs,
        out_specs=out_specs,
        scratch_shapes=[
            pltpu.VMEM((th + 2, wo + 2, c1p), jnp.bfloat16),   # conv1 out + halo
            pltpu.VMEM((m1, c1p), jnp.float32),                # conv1 accumulator
            pltpu.VMEM((m2, c2p), jnp.float32),                # conv2 accumulator
        ],
        compiler_params=pltpu.CompilerParams(
            dimension_semantics=("parallel", "parallel"),
            vmem_limit_bytes=vmem_limit),
    )(x_e, x_o, w1g, b1g, w2g, b2g)

    y = out[:, :, :c2].astype(jnp.float32).reshape(n, ho, wo, c2)  # drop lane pad
    return jnp.transpose(y, (0, 3, 1, 2))                          # NHWC -> NCHW


# ------------------------------- parameters -------------------------------- #
def init_params(key, n_features):
    """PyTorch Conv2d default init: uniform(-1/sqrt(fan_in), 1/sqrt(fan_in))."""
    f = n_features
    k1, k2, k3, k4 = jax.random.split(key, 4)
    bound1 = 1.0 / math.sqrt(f * 3 * 3)
    bound2 = 1.0 / math.sqrt(2 * f * 3 * 3)
    return {
        "w1": jax.random.uniform(k1, (2 * f, f, 3, 3), jnp.float32, -bound1, bound1),
        "b1": jax.random.uniform(k2, (2 * f,), jnp.float32, -bound1, bound1),
        "w2": jax.random.uniform(k3, (2 * f, 2 * f, 3, 3), jnp.float32, -bound2, bound2),
        "b2": jax.random.uniform(k4, (2 * f,), jnp.float32, -bound2, bound2),
    }


# ---------------------------- reference (XLA) ------------------------------ #
def reference_forward(x_nchw, params):
    def conv_relu(x, w, b, stride, pad):
        y = jax.lax.conv_general_dilated(
            x, w, (stride, stride), ((pad, pad), (pad, pad)),
            dimension_numbers=("NCHW", "OIHW", "NCHW"),
        )
        return jnp.maximum(y + b[None, :, None, None], 0.0)

    y = conv_relu(x_nchw, params["w1"], params["b1"], 2, 1)
    y = conv_relu(y, params["w2"], params["b2"], 1, 1)
    return y


if __name__ == "__main__":
    key = jax.random.PRNGKey(0)
    kx, kp = jax.random.split(key)

    n_features = 4
    x = jax.random.normal(kx, (2, n_features, 16, 16), jnp.float32)   # NCHW
    params = init_params(kp, n_features)

    out = jax.block_until_ready(down_block_forward(x, params))
    assert out.shape == (2, 2 * n_features, 8, 8), out.shape

    ref = reference_forward(x, params)
    # bf16 MXU operands / bf16 output (f32 accumulation) -> loosened tolerance.
    max_err = float(jnp.max(jnp.abs(out - ref)))
    assert jnp.allclose(out, ref, atol=5e-2, rtol=5e-2), f"mismatch, max_err={max_err}"

    print("KERNEL_OK")
</pallas_src>

<mosaic_0001>
module attributes {stable_mosaic.version = 11 : i64} {
  func.func @down_block_kernel(%arg0: i32, %arg1: i32, %arg2: memref<1x7x8x12xbf16, #tpu.memory_space<vmem>>, %arg3: memref<1x7x8x12xbf16, #tpu.memory_space<vmem>>, %arg4: memref<3x12x128xbf16, #tpu.memory_space<vmem>>, %arg5: memref<1x128xf32, #tpu.memory_space<vmem>>, %arg6: memref<3x384x128xbf16, #tpu.memory_space<vmem>>, %arg7: memref<1x128xf32, #tpu.memory_space<vmem>>, %arg8: memref<1x32x128xbf16, #tpu.memory_space<vmem>>, %arg9: memref<6x10x128xbf16, #tpu.memory_space<vmem>>, %arg10: memref<48x128xf32, #tpu.memory_space<vmem>>, %arg11: memref<32x128xf32, #tpu.memory_space<vmem>>) attributes {dimension_semantics = [#tpu.dimension_semantics<parallel>, #tpu.dimension_semantics<parallel>], iteration_bounds = array<i64: 2, 2>, scalar_prefetch = 0 : i64, scratch_operands = 3 : i64, tpu.core_type = #tpu.core_type<tc>, window_params = [{transform_indices = @transform_0, window_bounds = array<i64: 1, 7, 8, 12>}, {transform_indices = @transform_1, window_bounds = array<i64: 1, 7, 8, 12>}, {pipeline_mode = #tpu.pipeline_mode<synchronous>, transform_indices = @transform_2, window_bounds = array<i64: 3, 12, 128>}, {pipeline_mode = #tpu.pipeline_mode<synchronous>, transform_indices = @transform_3, window_bounds = array<i64: 1, 128>}, {pipeline_mode = #tpu.pipeline_mode<synchronous>, transform_indices = @transform_4, window_bounds = array<i64: 3, 384, 128>}, {pipeline_mode = #tpu.pipeline_mode<synchronous>, transform_indices = @transform_5, window_bounds = array<i64: 1, 128>}, {transform_indices = @transform_6, window_bounds = array<i64: 1, 32, 128>}]} {
    %c0 = arith.constant 0 : index
    %c0_0 = arith.constant 0 : index
    %c0_1 = arith.constant 0 : index
    %c0_2 = arith.constant 0 : index
    %0 = vector.load %arg2[%c0, %c0_0, %c0_1, %c0_2] : memref<1x7x8x12xbf16, #tpu.memory_space<vmem>>, vector<1x7x8x12xbf16>
    %1 = vector.shape_cast %0 : vector<1x7x8x12xbf16> to vector<7x8x12xbf16>
    %c0_3 = arith.constant 0 : index
    %c0_4 = arith.constant 0 : index
    %c0_5 = arith.constant 0 : index
    %c0_6 = arith.constant 0 : index
    %2 = vector.load %arg3[%c0_3, %c0_4, %c0_5, %c0_6] : memref<1x7x8x12xbf16, #tpu.memory_space<vmem>>, vector<1x7x8x12xbf16>
    %3 = vector.shape_cast %2 : vector<1x7x8x12xbf16> to vector<7x8x12xbf16>
    %4 = vector.extract_strided_slice %1 {offsets = [0, 0, 0], sizes = [6, 8, 12], strides = [1, 1, 1]} : vector<7x8x12xbf16> to vector<6x8x12xbf16>
    %5 = vector.shape_cast %4 : vector<6x8x12xbf16> to vector<48x12xbf16>
    %c0_7 = arith.constant 0 : index
    %c0_8 = arith.constant 0 : index
    %c0_9 = arith.constant 0 : index
    %6 = vector.load %arg4[%c0_7, %c0_8, %c0_9] : memref<3x12x128xbf16, #tpu.memory_space<vmem>>, vector<1x12x128xbf16>
    %7 = vector.shape_cast %6 : vector<1x12x128xbf16> to vector<12x128xbf16>
    %cst = arith.constant dense<0.000000e+00> : vector<48x128xf32>
    %8 = tpu.matmul %5, %7, %cst {dimension_numbers = #tpu.dot_dimension_numbers<[1], [0], [0], [1], [0, 0, 1, 1], [], []>} : vector<48x12xbf16>, vector<12x128xbf16>, vector<48x128xf32> -> vector<48x128xf32>
    %c0_10 = arith.constant 0 : index
    %c0_11 = arith.constant 0 : index
    %9 = vector.load %arg10[%c0_10, %c0_11] : memref<48x128xf32, #tpu.memory_space<vmem>>, vector<48x128xf32>
    tpu.vector_store %arg10[%c0_10, %c0_11], %8 {strides = array<i32>} : memref<48x128xf32, #tpu.memory_space<vmem>>, vector<48x128xf32>,
    %10 = vector.extract_strided_slice %3 {offsets = [0, 0, 0], sizes = [6, 8, 12], strides = [1, 1, 1]} : vector<7x8x12xbf16> to vector<6x8x12xbf16>
    %11 = vector.shape_cast %10 : vector<6x8x12xbf16> to vector<48x12xbf16>
    %c1 = arith.constant 1 : index
    %c0_12 = arith.constant 0 : index
    %c0_13 = arith.constant 0 : index
    %12 = vector.load %arg4[%c1, %c0_12, %c0_13] : memref<3x12x128xbf16, #tpu.memory_space<vmem>>, vector<1x12x128xbf16>
    %13 = vector.shape_cast %12 : vector<1x12x128xbf16> to vector<12x128xbf16>
    %cst_14 = arith.constant dense<0.000000e+00> : vector<48x128xf32>
    %14 = tpu.matmul %11, %13, %cst_14 {dimension_numbers = #tpu.dot_dimension_numbers<[1], [0], [0], [1], [0, 0, 1, 1], [], []>} : vector<48x12xbf16>, vector<12x128xbf16>, vector<48x128xf32> -> vector<48x128xf32>
    %c0_15 = arith.constant 0 : index
    %c0_16 = arith.constant 0 : index
    %15 = vector.load %arg10[%c0_15, %c0_16] : memref<48x128xf32, #tpu.memory_space<vmem>>, vector<48x128xf32>
    %16 = arith.addf %15, %14 : vector<48x128xf32>
    %c0_17 = arith.constant 0 : index
    %c0_18 = arith.constant 0 : index
    %17 = vector.load %arg10[%c0_17, %c0_18] : memref<48x128xf32, #tpu.memory_space<vmem>>, vector<48x128xf32>
    tpu.vector_store %arg10[%c0_17, %c0_18], %16 {strides = array<i32>} : memref<48x128xf32, #tpu.memory_space<vmem>>, vector<48x128xf32>,
    %18 = vector.extract_strided_slice %1 {offsets = [1, 0, 0], sizes = [6, 8, 12], strides = [1, 1, 1]} : vector<7x8x12xbf16> to vector<6x8x12xbf16>
    %19 = vector.shape_cast %18 : vector<6x8x12xbf16> to vector<48x12xbf16>
    %c2 = arith.constant 2 : index
    %c0_19 = arith.constant 0 : index
    %c0_20 = arith.constant 0 : index
    %20 = vector.load %arg4[%c2, %c0_19, %c0_20] : memref<3x12x128xbf16, #tpu.memory_space<vmem>>, vector<1x12x128xbf16>
    %21 = vector.shape_cast %20 : vector<1x12x128xbf16> to vector<12x128xbf16>
    %cst_21 = arith.constant dense<0.000000e+00> : vector<48x128xf32>
    %22 = tpu.matmul %19, %21, %cst_21 {dimension_numbers = #tpu.dot_dimension_numbers<[1], [0], [0], [1], [0, 0, 1, 1], [], []>} : vector<48x12xbf16>, vector<12x128xbf16>, vector<48x128xf32> -> vector<48x128xf32>
    %c0_22 = arith.constant 0 : index
    %c0_23 = arith.constant 0 : index
    %23 = vector.load %arg10[%c0_22, %c0_23] : memref<48x128xf32, #tpu.memory_space<vmem>>, vector<48x128xf32>
    %24 = arith.addf %23, %22 : vector<48x128xf32>
    %c0_24 = arith.constant 0 : index
    %c0_25 = arith.constant 0 : index
    %25 = vector.load %arg10[%c0_24, %c0_25] : memref<48x128xf32, #tpu.memory_space<vmem>>, vector<48x128xf32>
    tpu.vector_store %arg10[%c0_24, %c0_25], %24 {strides = array<i32>} : memref<48x128xf32, #tpu.memory_space<vmem>>, vector<48x128xf32>,
    %c0_26 = arith.constant 0 : index
    %c0_27 = arith.constant 0 : index
    %26 = vector.load %arg10[%c0_26, %c0_27] : memref<48x128xf32, #tpu.memory_space<vmem>>, vector<48x128xf32>
    %c0_28 = arith.constant 0 : index
    %c0_29 = arith.constant 0 : index
    %27 = vector.load %arg5[%c0_28, %c0_29] : memref<1x128xf32, #tpu.memory_space<vmem>>, vector<1x128xf32>
    %28 = vector.broadcast %27 : vector<1x128xf32> to vector<48x128xf32>
    %29 = arith.addf %26, %28 : vector<48x128xf32>
    %cst_30 = arith.constant 0.000000e+00 : f32
    %30 = vector.broadcast %cst_30 : f32 to vector<48x128xf32>
    %31 = arith.maximumf %29, %30 : vector<48x128xf32>
    %32 = vector.shape_cast %31 : vector<48x128xf32> to vector<6x8x128xf32>
    %c4_i32 = arith.constant 4 : i32
    %33 = arith.muli %arg1, %c4_i32 : i32
    %c1_i32 = arith.constant 1 : i32
    %34 = arith.subi %33, %c1_i32 : i32
    %35 = tpu.iota {dimensions = array<i32: 0>} : vector<6x1x1xi32>
    %36 = vector.broadcast %34 : i32 to vector<6x1x1xi32>
    %37 = arith.addi %36, %35 : vector<6x1x1xi32>
    %c0_i32 = arith.constant 0 : i32
    %38 = vector.broadcast %c0_i32 : i32 to vector<6x1x1xi32>
    %39 = arith.cmpi sge, %37, %38 : vector<6x1x1xi32>
    %c8_i32 = arith.constant 8 : i32
    %40 = vector.broadcast %c8_i32 : i32 to vector<6x1x1xi32>
    %41 = arith.cmpi slt, %37, %40 : vector<6x1x1xi32>
    %42 = arith.andi %39, %41 : vector<6x1x1xi1>
    %cst_31 = arith.constant 0.000000e+00 : f32
    %43 = vector.shape_cast %42 : vector<6x1x1xi1> to vector<6x1x1xi1>
    %44 = vector.broadcast %43 : vector<6x1x1xi1> to vector<6x8x128xi1>
    %45 = vector.broadcast %cst_31 : f32 to vector<6x8x128xf32>
    %46 = arith.select %44, %32, %45 : vector<6x8x128xi1>, vector<6x8x128xf32>
    %47 = arith.truncf %46 : vector<6x8x128xf32> to vector<6x8x128xbf16>
    %cst_32 = arith.constant 0.000000e+00 : bf16
    %48 = vector.broadcast %cst_32 : bf16 to vector<6x1x128xbf16>
    %c0_33 = arith.constant 0 : index
    %c0_34 = arith.constant 0 : index
    %c0_35 = arith.constant 0 : index
    %49 = vector.load %arg9[%c0_33, %c0_34, %c0_35] : memref<6x10x128xbf16, #tpu.memory_space<vmem>>, vector<6x1x128xbf16>
    tpu.vector_store %arg9[%c0_33, %c0_34, %c0_35], %48 {strides = array<i32>} : memref<6x10x128xbf16, #tpu.memory_space<vmem>>, vector<6x1x128xbf16>,
    %c0_36 = arith.constant 0 : index
    %c9 = arith.constant 9 : index
    %c0_37 = arith.constant 0 : index
    %50 = vector.load %arg9[%c0_36, %c9, %c0_37] : memref<6x10x128xbf16, #tpu.memory_space<vmem>>, vector<6x1x128xbf16>
    tpu.vector_store %arg9[%c0_36, %c9, %c0_37], %48 {strides = array<i32>} : memref<6x10x128xbf16, #tpu.memory_space<vmem>>, vector<6x1x128xbf16>,
    %c0_38 = arith.constant 0 : index
    %c1_39 = arith.constant 1 : index
    %c0_40 = arith.constant 0 : index
    %51 = vector.load %arg9[%c0_38, %c1_39, %c0_40] : memref<6x10x128xbf16, #tpu.memory_space<vmem>>, vector<6x8x128xbf16>
    tpu.vector_store %arg9[%c0_38, %c1_39, %c0_40], %47 {strides = array<i32>} : memref<6x10x128xbf16, #tpu.memory_space<vmem>>, vector<6x8x128xbf16>,
    %c0_41 = arith.constant 0 : index
    %c0_42 = arith.constant 0 : index
    %c0_43 = arith.constant 0 : index
    %52 = vector.load %arg9[%c0_41, %c0_42, %c0_43] : memref<6x10x128xbf16, #tpu.memory_space<vmem>>, vector<4x8x128xbf16>
    %c0_44 = arith.constant 0 : index
    %c1_45 = arith.constant 1 : index
    %c0_46 = arith.constant 0 : index
    %53 = vector.load %arg9[%c0_44, %c1_45, %c0_46] : memref<6x10x128xbf16, #tpu.memory_space<vmem>>, vector<4x8x128xbf16>
    %c0_47 = arith.constant 0 : index
    %c2_48 = arith.constant 2 : index
    %c0_49 = arith.constant 0 : index
    %54 = vector.load %arg9[%c0_47, %c2_48, %c0_49] : memref<6x10x128xbf16, #tpu.memory_space<vmem>>, vector<4x8x128xbf16>
    %55 = tpu.concatenate %52, %53, %54 in 2 : vector<4x8x128xbf16>, vector<4x8x128xbf16>, vector<4x8x128xbf16> -> vector<4x8x384xbf16>
    %56 = vector.shape_cast %55 : vector<4x8x384xbf16> to vector<32x384xbf16>
    %c0_50 = arith.constant 0 : index
    %c0_51 = arith.constant 0 : index
    %c0_52 = arith.constant 0 : index
    %57 = vector.load %arg6[%c0_50, %c0_51, %c0_52] : memref<3x384x128xbf16, #tpu.memory_space<vmem>>, vector<1x384x128xbf16>
    %58 = vector.shape_cast %57 : vector<1x384x128xbf16> to vector<384x128xbf16>
    %cst_53 = arith.constant dense<0.000000e+00> : vector<32x128xf32>
    %59 = tpu.matmul %56, %58, %cst_53 {dimension_numbers = #tpu.dot_dimension_numbers<[1], [0], [0], [1], [0, 0, 1, 1], [], []>} : vector<32x384xbf16>, vector<384x128xbf16>, vector<32x128xf32> -> vector<32x128xf32>
    %c0_54 = arith.constant 0 : index
    %c0_55 = arith.constant 0 : index
    %60 = vector.load %arg11[%c0_54, %c0_55] : memref<32x128xf32, #tpu.memory_space<vmem>>, vector<32x128xf32>
    tpu.vector_store %arg11[%c0_54, %c0_55], %59 {strides = array<i32>} : memref<32x128xf32, #tpu.memory_space<vmem>>, vector<32x128xf32>,
    %c1_56 = arith.constant 1 : index
    %c0_57 = arith.constant 0 : index
    %c0_58 = arith.constant 0 : index
    %61 = vector.load %arg9[%c1_56, %c0_57, %c0_58] : memref<6x10x128xbf16, #tpu.memory_space<vmem>>, vector<4x8x128xbf16>
    %c1_59 = arith.constant 1 : index
    %c1_60 = arith.constant 1 : index
    %c0_61 = arith.constant 0 : index
    %62 = vector.load %arg9[%c1_59, %c1_60, %c0_61] : memref<6x10x128xbf16, #tpu.memory_space<vmem>>, vector<4x8x128xbf16>
    %c1_62 = arith.constant 1 : index
    %c2_63 = arith.constant 2 : index
    %c0_64 = arith.constant 0 : index
    %63 = vector.load %arg9[%c1_62, %c2_63, %c0_64] : memref<6x10x128xbf16, #tpu.memory_space<vmem>>, vector<4x8x128xbf16>
    %64 = tpu.concatenate %61, %62, %63 in 2 : vector<4x8x128xbf16>, vector<4x8x128xbf16>, vector<4x8x128xbf16> -> vector<4x8x384xbf16>
    %65 = vector.shape_cast %64 : vector<4x8x384xbf16> to vector<32x384xbf16>
    %c1_65 = arith.constant 1 : index
    %c0_66 = arith.constant 0 : index
    %c0_67 = arith.constant 0 : index
    %66 = vector.load %arg6[%c1_65, %c0_66, %c0_67] : memref<3x384x128xbf16, #tpu.memory_space<vmem>>, vector<1x384x128xbf16>
    %67 = vector.shape_cast %66 : vector<1x384x128xbf16> to vector<384x128xbf16>
    %cst_68 = arith.constant dense<0.000000e+00> : vector<32x128xf32>
    %68 = tpu.matmul %65, %67, %cst_68 {dimension_numbers = #tpu.dot_dimension_numbers<[1], [0], [0], [1], [0, 0, 1, 1], [], []>} : vector<32x384xbf16>, vector<384x128xbf16>, vector<32x128xf32> -> vector<32x128xf32>
    %c0_69 = arith.constant 0 : index
    %c0_70 = arith.constant 0 : index
    %69 = vector.load %arg11[%c0_69, %c0_70] : memref<32x128xf32, #tpu.memory_space<vmem>>, vector<32x128xf32>
    %70 = arith.addf %69, %68 : vector<32x128xf32>
    %c0_71 = arith.constant 0 : index
    %c0_72 = arith.constant 0 : index
    %71 = vector.load %arg11[%c0_71, %c0_72] : memref<32x128xf32, #tpu.memory_space<vmem>>, vector<32x128xf32>
    tpu.vector_store %arg11[%c0_71, %c0_72], %70 {strides = array<i32>} : memref<32x128xf32, #tpu.memory_space<vmem>>, vector<32x128xf32>,
    %c2_73 = arith.constant 2 : index
    %c0_74 = arith.constant 0 : index
    %c0_75 = arith.constant 0 : index
    %72 = vector.load %arg9[%c2_73, %c0_74, %c0_75] : memref<6x10x128xbf16, #tpu.memory_space<vmem>>, vector<4x8x128xbf16>
    %c2_76 = arith.constant 2 : index
    %c1_77 = arith.constant 1 : index
    %c0_78 = arith.constant 0 : index
    %73 = vector.load %arg9[%c2_76, %c1_77, %c0_78] : memref<6x10x128xbf16, #tpu.memory_space<vmem>>, vector<4x8x128xbf16>
    %c2_79 = arith.constant 2 : index
    %c2_80 = arith.constant 2 : index
    %c0_81 = arith.constant 0 : index
    %74 = vector.load %arg9[%c2_79, %c2_80, %c0_81] : memref<6x10x128xbf16, #tpu.memory_space<vmem>>, vector<4x8x128xbf16>
    %75 = tpu.concatenate %72, %73, %74 in 2 : vector<4x8x128xbf16>, vector<4x8x128xbf16>, vector<4x8x128xbf16> -> vector<4x8x384xbf16>
    %76 = vector.shape_cast %75 : vector<4x8x384xbf16> to vector<32x384xbf16>
    %c2_82 = arith.constant 2 : index
    %c0_83 = arith.constant 0 : index
    %c0_84 = arith.constant 0 : index
    %77 = vector.load %arg6[%c2_82, %c0_83, %c0_84] : memref<3x384x128xbf16, #tpu.memory_space<vmem>>, vector<1x384x128xbf16>
    %78 = vector.shape_cast %77 : vector<1x384x128xbf16> to vector<384x128xbf16>
    %cst_85 = arith.constant dense<0.000000e+00> : vector<32x128xf32>
    %79 = tpu.matmul %76, %78, %cst_85 {dimension_numbers = #tpu.dot_dimension_numbers<[1], [0], [0], [1], [0, 0, 1, 1], [], []>} : vector<32x384xbf16>, vector<384x128xbf16>, vector<32x128xf32> -> vector<32x128xf32>
    %c0_86 = arith.constant 0 : index
    %c0_87 = arith.constant 0 : index
    %80 = vector.load %arg11[%c0_86, %c0_87] : memref<32x128xf32, #tpu.memory_space<vmem>>, vector<32x128xf32>
    %81 = arith.addf %80, %79 : vector<32x128xf32>
    %c0_88 = arith.constant 0 : index
    %c0_89 = arith.constant 0 : index
    %82 = vector.load %arg11[%c0_88, %c0_89] : memref<32x128xf32, #tpu.memory_space<vmem>>, vector<32x128xf32>
    tpu.vector_store %arg11[%c0_88, %c0_89], %81 {strides = array<i32>} : memref<32x128xf32, #tpu.memory_space<vmem>>, vector<32x128xf32>,
    %c0_90 = arith.constant 0 : index
    %c0_91 = arith.constant 0 : index
    %83 = vector.load %arg11[%c0_90, %c0_91] : memref<32x128xf32, #tpu.memory_space<vmem>>, vector<32x128xf32>
    %c0_92 = arith.constant 0 : index
    %c0_93 = arith.constant 0 : index
    %84 = vector.load %arg7[%c0_92, %c0_93] : memref<1x128xf32, #tpu.memory_space<vmem>>, vector<1x128xf32>
    %85 = vector.broadcast %84 : vector<1x128xf32> to vector<32x128xf32>
    %86 = arith.addf %83, %85 : vector<32x128xf32>
    %cst_94 = arith.constant 0.000000e+00 : f32
    %87 = vector.broadcast %cst_94 : f32 to vector<32x128xf32>
    %88 = arith.maximumf %86, %87 : vector<32x128xf32>
    %89 = arith.truncf %88 : vector<32x128xf32> to vector<32x128xbf16>
    %c0_95 = arith.constant 0 : index
    %c0_96 = arith.constant 0 : index
    %c0_97 = arith.constant 0 : index
    %90 = vector.load %arg8[%c0_95, %c0_96, %c0_97] : memref<1x32x128xbf16, #tpu.memory_space<vmem>>, vector<1x32x128xbf16>
    %91 = vector.shape_cast %90 : vector<1x32x128xbf16> to vector<32x128xbf16>
    %92 = vector.shape_cast %89 : vector<32x128xbf16> to vector<1x32x128xbf16>
    tpu.vector_store %arg8[%c0_95, %c0_96, %c0_97], %92 {strides = array<i32>} : memref<1x32x128xbf16, #tpu.memory_space<vmem>>, vector<1x32x128xbf16>,
    return
  }
  func.func @transform_0(%arg0: i32, %arg1: i32) -> (i32, i32, i32, i32) {
    %c2_i32 = arith.constant 2 : i32
    %0 = arith.muli %arg0, %c2_i32 : i32
    %1 = arith.addi %0, %arg1 : i32
    %c0_i32 = arith.constant 0 : i32
    %c0_i32_0 = arith.constant 0 : i32
    %c0_i32_1 = arith.constant 0 : i32
    %c0_i32_2 = arith.constant 0 : i32
    return %1, %c0_i32, %c0_i32_0, %c0_i32_1 : i32, i32, i32, i32
  }
  func.func @transform_1(%arg0: i32, %arg1: i32) -> (i32, i32, i32, i32) {
    %c2_i32 = arith.constant 2 : i32
    %0 = arith.muli %arg0, %c2_i32 : i32
    %1 = arith.addi %0, %arg1 : i32
    %c0_i32 = arith.constant 0 : i32
    %c0_i32_0 = arith.constant 0 : i32
    %c0_i32_1 = arith.constant 0 : i32
    %c0_i32_2 = arith.constant 0 : i32
    return %1, %c0_i32, %c0_i32_0, %c0_i32_1 : i32, i32, i32, i32
  }
  func.func @transform_2(%arg0: i32, %arg1: i32) -> (i32, i32, i32) {
    %c0_i32 = arith.constant 0 : i32
    %c0_i32_0 = arith.constant 0 : i32
    %c0_i32_1 = arith.constant 0 : i32
    %c0_i32_2 = arith.constant 0 : i32
    return %c0_i32, %c0_i32_0, %c0_i32_1 : i32, i32, i32
  }
  func.func @transform_3(%arg0: i32, %arg1: i32) -> (i32, i32) {
    %c0_i32 = arith.constant 0 : i32
    %c0_i32_0 = arith.constant 0 : i32
    %c0_i32_1 = arith.constant 0 : i32
    return %c0_i32, %c0_i32_0 : i32, i32
  }
  func.func @transform_4(%arg0: i32, %arg1: i32) -> (i32, i32, i32) {
    %c0_i32 = arith.constant 0 : i32
    %c0_i32_0 = arith.constant 0 : i32
    %c0_i32_1 = arith.constant 0 : i32
    %c0_i32_2 = arith.constant 0 : i32
    return %c0_i32, %c0_i32_0, %c0_i32_1 : i32, i32, i32
  }
  func.func @transform_5(%arg0: i32, %arg1: i32) -> (i32, i32) {
    %c0_i32 = arith.constant 0 : i32
    %c0_i32_0 = arith.constant 0 : i32
    %c0_i32_1 = arith.constant 0 : i32
    return %c0_i32, %c0_i32_0 : i32, i32
  }
  func.func @transform_6(%arg0: i32, %arg1: i32) -> (i32, i32, i32) {
    %c0_i32 = arith.constant 0 : i32
    %c0_i32_0 = arith.constant 0 : i32
    return %arg0, %arg1, %c0_i32 : i32, i32, i32
  }
}

</mosaic_0001>

<bundles_post_ra>
// kernel: down_block_forward.1
= control target key start
LH: loop header
LB: loop body
LE: loop exit
PB: predicated region body
PF: predicated region fallthrough
CT: control target
= control target key end

     0   :  { %s2955_s21 = smov 0   ;;  %s2957_s22 = smov 0   ;;  %s3420_s0 = inlined_call_operand.vmem [shape: bf16[4,7,8,12], index: 0, kind: input, shape index: {}]   ;;  %s3421_s1 = inlined_call_operand.vmem [shape: bf16[4,7,8,12], index: 1, kind: input, shape index: {}]   ;;  %s3422_s2 = inlined_call_operand.vmem [shape: bf16[3,12,128], index: 2, kind: input, shape index: {}]   ;;  %s3423_s3 = inlined_call_operand.vmem [shape: f32[1,128], index: 3, kind: input, shape index: {}]   ;;  %s3424_s4 = inlined_call_operand.vmem [shape: bf16[3,384,128], index: 4, kind: input, shape index: {}]   ;;  %s3425_s5 = inlined_call_operand.vmem [shape: f32[1,128], index: 5, kind: input, shape index: {}]   ;;  %s3426_s6 = inlined_call_operand.vmem [shape: bf16[2,64,128], index: 6, kind: output, shape index: {}]  }
   0x1   :  { %s2959_s23 = smov 0   ;;  %s2961_s24 = smov 0  }
   0x2   :  { %s2963_s25 = smov 0  }
   0x3 LB: > { %s25_s26 = sadd.s32 1, %s2908_s23  ;;  %s28_s27 = sadd.s32 1, %s2912_s24  ;;  %s2916_s25 = sphi %s2963_s25, %s16_s25   ;;  %s2912_s24 = sphi %s2961_s24, %s3438_s24   ;;  %s2908_s23 = sphi %s2959_s23, %s3437_s23   ;;  %s2904_s22 = sphi %s2957_s22, %s3436_s22   ;;  %s2900_s21 = sphi %s2955_s21, %s3435_s21  }
   0x4   : > { %p26_p0 = scmp.ge.s32.totalorder %s25_s26, 2  ;;  %p2211_p1 = scmp.ge.s32.totalorder %s2916_s25, 1 }
   0x5   : > { %p252_p2 = scmp.lt.s32.totalorder %s2916_s25, 5 }
   0x6   : > { %s3440_s26 = smov (%p26_p0, %s25_s26), 0  ;;  %s3442_s27 = smov (!%p26_p0, %s28_s27), %s2912_s24 }
   0x7   : > { %p253_p3 = pnand %p2211_p1, %p252_p2  ;;  %p30_p4 = scmp.ge.s32.totalorder %s3442_s27, 2 }
   0x8   : > { %s2212_s30 = sshll.u32 (!%p253_p3), %s2904_s22, 1  ;;  %s3155_s20 = sshll.u32 (!%p253_p3), %s2900_s21, 2 }
   0x9   : > { %s3444_s27 = smov (%p30_p4, %s3442_s27), 0  ;;  %256 = sbr.rel (%p253_p3) target bundleno = 554 (0x22a), region = 44 }
   0xa   : > { %s296_s7 = sadd.s32 (!%p253_p3), %s2900_s21, %s2212_s30  ;;  %s2246_s28 = sadd.s32 (!%p253_p3), 4294967295, %s3155_s20 }
   0xb   : > { %p297_p5 = scmp.lt.s32.totalorder (!%p253_p3), %s296_s7, 3  ;;  %p314_p6 = scmp.lt.s32.totalorder (!%p253_p3), %s2904_s22, 1 }
   0xc   : > { %p316_p7 = scmp.lt.s32.totalorder (!%p253_p3), %s3155_s20, 7 }
   0xe   : > { %vm369_vm0 = vcmask 1045504   ;;  %v2918_v0 = vmov 0.0   ;;  %v2764_v1 = vld [vmem:[%s3422_s2] sm:$0x3f]   ;;  %vm2919_vm1 = vmmov 0   ;;  %s3446_s7 = smov (!%p297_p5, %s296_s7), 3 }
   0xf   : > { %2617 = vmatprep.subr.bf16.mxu0 %v2918_v0  ;;  %2719 = vmatprep.subr.bf16.mxu1 %v2918_v0  ;;  %v371_v2 = vsel %vm369_vm0, %v2764_v1, 0  ;;  %v2767_v3 = vld [vmem:[%s3422_s2 + $0x10] sm:$0x3f]   ;;  %v2768_v4 = vld [vmem:[%s3422_s2 + $0x8] sm:$0x3f]   ;;  %s2721_s12 = smul.u32 28, %s3446_s7 }
  0x10   : > { %2619 = vmatprep.mubr.msk.bf16.mxu0 %vm2919_vm1, %v2918_v0  ;;  %2627 = vmatprep.mubr.msk.bf16.mxu1 %vm2919_vm1, %v2918_v0  ;;  %vm359_vm2 = vcmask 97280   ;;  %v569_v10 = vsel %vm369_vm0, %v2767_v3, 0  ;;  %v469_v12 = vsel %vm369_vm0, %v2768_v4, 0  ;;  %vm721_vm3 = vcmask 1040384   ;;  %v2776_v23 = vld [vmem:[%s3424_s4 + $0x78] sm:$0xff]   ;;  %v2779_v32 = vld [vmem:[%s3424_s4 + $0x70] sm:$0xff]  }
  0x11   : > { %2618 = vmatpush3.bf16.msra.mxu0 %v371_v2  ;;  %2720 = vmatpush3.bf16.msra.mxu1 %v371_v2  ;;  %s3006_s15 = scalar_lea.vmem %s3420_s0, %s2721_s12  ;;  %s310_s18 = scalar_lea.vmem %s3421_s1, %s2721_s12  ;;  %vm722_vm4 = vsmask.f32 256  ;;  %v724_v24 = vld [vmem:[#allocation2] sm:$0x1]  ;;  %vm742_vm5 = vsmask.f32 7938 }
  0x12   : > { %2645 = vmatprep.subr.bf16.mxu0 %v2918_v0  ;;  %2631 = vmatprep.subr.bf16.mxu1 %v2918_v0  ;;  %v324_v5 = vld [vmem:[%s3006_s15] sm:$0xf]  ;;  %v325_v6 = vld [vmem:[%s3006_s15 + $0x4] sm:$0xf]  ;;  %v328_v7 = vld [vmem:[%s3006_s15 + $0x10] sm:$0xf] }
  0x13   : > { %v2219_v8 = vcombine.low %v324_v5, %v325_v6  ;;  %v329_v9 = vld [vmem:[%s3006_s15 + $0x14] sm:$0xf]  ;;  %v326_v13 = vld [vmem:[%s3006_s15 + $0x8] sm:$0xf]  ;;  %v327_v14 = vld [vmem:[%s3006_s15 + $0xc] sm:$0xf] }
  0x14   : > { %v2221_v11 = vcombine.low %v328_v7, %v329_v9  ;;  %v2771_v15 = vld [vmem:[%s310_s18] sm:$0xff]   ;;  %v2220_v16 = vcombine.low %v326_v13, %v327_v14  ;;  %v2772_v17 = vld [vmem:[%s310_s18 + $0x8] sm:$0xff]   ;;  %v2237_v18 = vcombine.low %v325_v6, %v326_v13  ;;  %v2773_v19 = vld [vmem:[%s310_s18 + $0x10] sm:$0xff]   ;;  %v2238_v20 = vcombine.low %v327_v14, %v328_v7  ;;  %s3448_s22 = smov (!%p314_p6, %s2904_s22), 1  ;;  %s3450_s20 = smov (!%p316_p7, %s3155_s20), 7 }
  0x15   : > { %2620 = vmatmul.mubr.msk.bf16.vlgmr.msra.gmra.mxu0 %vm359_vm2, %v2219_v8  ;;  %v330_v21 = vld [vmem:[%s3006_s15 + $0x18] sm:$0xf]  ;;  %v744_v25 = vld [vmem:[#allocation2 + $0x4] sm:$0x1]  ;;  %vm3039_vm6 = vmand %vm721_vm3, %vm722_vm4  ;;  %vm840_vm0 = vcmask 1043456   ;;  %s2217_s13 = sshll.u32 %s3448_s22, 3 }
  0x16   : > { %2628 = vmatmul.mubr.msk.bf16.vlgmr.msra.gmra.mxu1 %vm359_vm2, %v2221_v11  ;;  %2646 = vmatpush3.bf16.msra.mxu0 %v569_v10  ;;  %v2239_v22 = vcombine.low %v329_v9, %v330_v21  ;;  %v2777_v27 = vld [vmem:[%s3424_s4 + $0x38] sm:$0xff]   ;;  %v725_v28 = vsel %vm3039_vm6, 0, %v724_v24  ;;  %vm3049_vm7 = vmand %vm721_vm3, %vm742_vm5  ;;  %v727_v33 = vld [vmem:[#allocation2 + $0x8] sm:$0x1]  ;;  %s319_s16 = sadd.s32 %s2217_s13, %s3450_s20 }
  0x17   : > { %2632 = vmatpush3.bf16.msra.mxu1 %v469_v12  ;;  %2623 = vmatprep.mubr.msk.bf16.mxu0 %vm2919_vm1, %v2918_v0  ;;  %v2778_v30 = vld [vmem:[%s3424_s4 + $0xb8] sm:$0xff]   ;;  %726 = vst [vmem:[#allocation2] sm:$0x1] %v725_v28  ;;  %v745_v31 = vsel %vm3049_vm7, 0, %v744_v25  ;;  %v747_v34 = vld [vmem:[#allocation2 + $0xc] sm:$0x1] }
  0x18   : > { %2633 = vmatprep.mubr.msk.bf16.mxu1 %vm2919_vm1, %v2918_v0  ;;  %2503 = vmatprep.subr.bf16.mxu1 %v2776_v23  ;;  %746 = vst [vmem:[#allocation2 + $0x4] sm:$0x1] %v745_v31  ;;  %v728_v35 = vsel %vm3039_vm6, 0, %v727_v33  ;;  %v748_v36 = vsel %vm3049_vm7, 0, %v747_v34  ;;  %v2780_v37 = vld [vmem:[%s3424_s4 + $0x30] sm:$0xff]   ;;  %v2782_v43 = vld [vmem:[%s3424_s4 + $0x68] sm:$0xff]  }
  0x19   : > { %2659 = vmatprep.subr.bf16.mxu0 %v2778_v30  ;;  %729 = vst [vmem:[#allocation2 + $0x8] sm:$0x1] %v728_v35  ;;  %749 = vst [vmem:[#allocation2 + $0xc] sm:$0x1] %v748_v36  ;;  %v2781_v38 = vld [vmem:[%s3424_s4 + $0xb0] sm:$0xff]   ;;  %v2783_v44 = vld [vmem:[%s3424_s4 + $0x28] sm:$0xff]  }
  0x1a   : > { %v730_v39 = vld [vmem:[#allocation2 + $0x10] sm:$0x1]  ;;  %v750_v40 = vld [vmem:[#allocation2 + $0x14] sm:$0x1]  ;;  %v2784_v45 = vld [vmem:[%s3424_s4 + $0xa8] sm:$0xff]   ;;  %s2218_s22 = sshll.u32 %s319_s16, 2 }
  0x1b   : > { %v731_v41 = vsel %vm3039_vm6, 0, %v730_v39  ;;  %v751_v42 = vsel %vm3049_vm7, 0, %v750_v40  ;;  %v2785_v46 = vld [vmem:[%s3424_s4 + $0x60] sm:$0xff]   ;;  %v733_v47 = vld [vmem:[#allocation2 + $0x18] sm:$0x1]  ;;  %v2791_v60 = vld [vmem:[%s3424_s4 + $0x50] sm:$0xff]   ;;  %s321_s20 = scalar_lea.vmem %s3426_s6, %s2218_s22 }
  0x1c   : > { %732 = vst [vmem:[#allocation2 + $0x10] sm:$0x1] %v731_v41  ;;  %752 = vst [vmem:[#allocation2 + $0x14] sm:$0x1] %v751_v42  ;;  %v753_v48 = vld [vmem:[#allocation2 + $0x1c] sm:$0x1] }
  0x1d   : > { %2624 = vmatmul.mubr.msk.bf16.gmra.mxu0 %vm359_vm2, %v2220_v16  ;;  %v2786_v49 = vld [vmem:[%s3424_s4 + $0x20] sm:$0xff]   ;;  %v734_v50 = vsel %vm3039_vm6, 0, %v733_v47  ;;  %v754_v51 = vsel %vm3049_vm7, 0, %v753_v48  ;;  %v2788_v53 = vld [vmem:[%s3424_s4 + $0x58] sm:$0xff]   ;;  %v739_v61 = vld [vmem:[#allocation2 + $0x28] sm:$0x1] }
  0x1e   : > { %2634 = vmatmul.mubr.msk.bf16.vlgmr.msra.gmra.mxu1 %vm359_vm2, %v2771_v15  ;;  %2647 = vmatprep.mubr.msk.bf16.mxu0 %vm2919_vm1, %v2918_v0  ;;  %v2787_v52 = vld [vmem:[%s3424_s4 + $0xa0] sm:$0xff]   ;;  %735 = vst [vmem:[#allocation2 + $0x18] sm:$0x1] %v734_v50  ;;  %755 = vst [vmem:[#allocation2 + $0x1c] sm:$0x1] %v754_v51  ;;  %v2789_v56 = vld [vmem:[%s3424_s4 + $0x18] sm:$0xff]  }
  0x1f   : > { %2637 = vmatprep.mubr.msk.bf16.mxu1 %vm2919_vm1, %v2918_v0  ;;  %2504 = vmatpush3.bf16.msra.mxu1 %v2777_v27  ;;  %v736_v54 = vld [vmem:[#allocation2 + $0x20] sm:$0x1]  ;;  %v756_v55 = vld [vmem:[#allocation2 + $0x24] sm:$0x1]  ;;  %v2790_v59 = vld [vmem:[%s3424_s4 + $0x98] sm:$0xff]   ;;  %v740_v63 = vsel %vm3039_vm6, 0, %v739_v61  ;;  %v3158_v27 = vstv %s2246_s28 }
  0x20   : > { %2505 = vmatprep.subr.bf16.mxu1 %v2779_v32  ;;  %v737_v57 = vsel %vm3039_vm6, 0, %v736_v54  ;;  %v757_v58 = vsel %vm3049_vm7, 0, %v756_v55  ;;  %v759_v62 = vld [vmem:[#allocation2 + $0x2c] sm:$0x1]  ;;  %v2792_v1 = vld [vmem:[%s3424_s4 + $0x10] sm:$0xff]   ;;  %v2797_v6 = vld [vmem:[%s3424_s4 + $0x40] sm:$0xff]  }
  0x21   : > { %738 = vst [vmem:[#allocation2 + $0x20] sm:$0x1] %v737_v57  ;;  %758 = vst [vmem:[#allocation2 + $0x24] sm:$0x1] %v757_v58  ;;  %v2793_v2 = vld [vmem:[%s3424_s4 + $0x90] sm:$0xff]   ;;  %v2794_v3 = vld [vmem:[%s3424_s4 + $0x48] sm:$0xff]  }
  0x22   : > { %741 = vst [vmem:[#allocation2 + $0x28] sm:$0x1] %v740_v63  ;;  %v2795_v4 = vld [vmem:[%s3424_s4 + $0x8] sm:$0xff]   ;;  %v2803_v7 = vld [vmem:[%s3424_s4] sm:$0xff]   ;;  %v2805_v9 = vld [vmem:[%s3424_s4 + $0x138] sm:$0xff]   ;;  %vm679_vm8 = vcmp.ge.s32.totalorder %v3158_v27, 0 }
  0x23   : > { %2506 = vmatpush3.bf16.msra.mxu1 %v2780_v37  ;;  %v2796_v5 = vld [vmem:[%s3424_s4 + $0x88] sm:$0xff]   ;;  %v2804_v8 = vld [vmem:[%s3424_s4 + $0x80] sm:$0xff]   ;;  %v3147_v10 = vld [vmem:[%s3424_s4 + $0x178] sm:$0xff]   ;;  %vm685_vm9 = vcmp.lt.s32.totalorder %v3158_v27, 8  ;;  %v674_v34 = vadd.s32 1, %v3158_v27  ;;  %v675_v40 = vadd.s32 2, %v3158_v27 }
  0x24   : > { %2507 = vmatprep.subr.bf16.mxu1 %v2782_v43  ;;  %v3163_v31 = vld [vmem:[%s3423_s3] ss:$0 sm:$0xff]  ;;  %vm691_vm10 = vmand %vm679_vm8, %vm685_vm9  ;;  %v676_v54 = vadd.s32 3, %v3158_v27  ;;  %v677_v57 = vadd.s32 4, %v3158_v27 }
  0x25   : > { %2648 = vmatmul.mubr.msk.bf16.vlgmr.msra.gmra.mxu0 %vm359_vm2, %v2237_v18  ;;  %vm680_vm11 = vcmp.ge.s32.totalorder %v674_v34, 0  ;;  %vm686_vm12 = vcmp.lt.s32.totalorder %v674_v34, 8  ;;  %vm681_vm14 = vcmp.ge.s32.totalorder %v675_v40, 0  ;;  %vm687_vm15 = vcmp.lt.s32.totalorder %v675_v40, 8 }
  0x26   : > { %2638 = vmatmul.mubr.msk.bf16.gmra.mxu1 %vm359_vm2, %v2772_v17  ;;  %2651 = vmatprep.mubr.msk.bf16.mxu0 %vm2919_vm1, %v2918_v0  ;;  %vm692_vm13 = vmand %vm680_vm11, %vm686_vm12  ;;  %vm682_vm3 = vcmp.ge.s32.totalorder %v676_v54, 0  ;;  %vm688_vm4 = vcmp.lt.s32.totalorder %v676_v54, 8  ;;  %vm689_vm8 = vcmp.lt.s32.totalorder %v677_v57, 8 }
  0x27   : > { %2641 = vmatprep.mubr.msk.bf16.mxu1 %vm2919_vm1, %v2918_v0  ;;  %2660 = vmatpush3.bf16.msra.mxu0 %v2778_v30 }
  0x28   : > { %2661 = vmatprep.subr.bf16.mxu0 %v2781_v38  ;;  %2508 = vmatpush3.bf16.msra.mxu1 %v2783_v44 }
  0x29   : > { %2509 = vmatprep.subr.bf16.mxu1 %v2785_v46 }
  0x2b   : > { %2662 = vmatpush3.bf16.msra.mxu0 %v2781_v38 }
  0x2c   : > { %2663 = vmatprep.subr.bf16.mxu0 %v2784_v45  ;;  %2510 = vmatpush3.bf16.msra.mxu1 %v2786_v49 }
  0x2d   : > { %2652 = vmatmul.mubr.msk.bf16.gmra.mxu0 %vm359_vm2, %v2238_v20  ;;  %2511 = vmatprep.subr.bf16.mxu1 %v2788_v53 }
  0x2e   : > { %2642 = vmatmul.mubr.msk.bf16.gmra.mxu1 %vm359_vm2, %v2773_v19  ;;  %2655 = vmatprep.mubr.msk.bf16.mxu0 %vm2919_vm1, %v2918_v0  ;;  %v760_v0 = vsel %vm3049_vm7, 0, %v759_v62  ;;  %vm3175_vm1 = vmand %vm681_vm14, %vm687_vm15  ;;  %vm683_vm7 = vcmp.ge.s32.totalorder %v677_v57, 0 }
  0x2f   : > { %2664 = vmatpush3.bf16.msra.mxu0 %v2784_v45  ;;  %761 = vst [vmem:[#allocation2 + $0x2c] sm:$0x1] %v760_v0  ;;  %v842_v0 = vld [vmem:[#allocation2] sm:$0xf]  ;;  %vm695_vm9 = vmand %vm683_vm7, %vm689_vm8 }
  0x30   : > { %2665 = vmatprep.subr.bf16.mxu0 %v2787_v52  ;;  %2512 = vmatpush3.bf16.msra.mxu1 %v2789_v56 }
  0x31   : > { %2513 = vmatprep.subr.bf16.mxu1 %v2791_v60 }
  0x33   : > { %2666 = vmatpush3.bf16.msra.mxu0 %v2787_v52 }
  0x34   : > { %2667 = vmatprep.subr.bf16.mxu0 %v2790_v59  ;;  %2514 = vmatpush3.bf16.msra.mxu1 %v2792_v1 }
  0x35   : > { %2656 = vmatmul.mubr.msk.bf16.gmra.mxu0 %vm359_vm2, %v2239_v22  ;;  %2515 = vmatprep.subr.bf16.mxu1 %v2794_v3  ;;  %vm3180_vm2 = vmand %vm840_vm0, %vm742_vm5 }
  0x36   : > { %vm694_vm5 = vmand %vm682_vm3, %vm688_vm4 }
  0x37   : > { %2668 = vmatpush3.bf16.msra.mxu0 %v2790_v59 }
  0x38   : > { %2669 = vmatprep.subr.bf16.mxu0 %v2793_v2  ;;  %2516 = vmatpush3.bf16.msra.mxu1 %v2795_v4 }
  0x39   : > { %2517 = vmatprep.subr.bf16.mxu1 %v2797_v6 }
  0x3b   : > { %2670 = vmatpush3.bf16.msra.mxu0 %v2793_v2 }
  0x3c   : > { %2671 = vmatprep.subr.bf16.mxu0 %v2796_v5  ;;  %2518 = vmatpush3.bf16.msra.mxu1 %v2803_v7 }
  0x3d   : > { %2541 = vmatprep.subr.bf16.mxu1 %v2805_v9 }
  0x3f   : > { %2672 = vmatpush3.bf16.msra.mxu0 %v2796_v5  ;;  %v845_v5 = vld [vmem:[#allocation2 + $0x4] sm:$0x1] }
  0x40   : > { %2673 = vmatprep.subr.bf16.mxu0 %v2804_v8 }
  0x43   : > { %2674 = vmatpush3.bf16.msra.mxu0 %v2804_v8 }
  0x44   : > { %2679 = vmatprep.subr.bf16.mxu0 %v3147_v10 }
  0xd5   : > { %v407_v11 = vpop.f32.mrf.mxu0 }
  0xd6   : > { %v3150_v12 = vpop.f32.mrf.mxu1 }
  0xd7   : > { %v2621_v13 = vpop.f32.mrf.mxu0 }
  0xd8   : > { %v2629_v14 = vpop.f32.mrf.mxu1 }
  0xd9   : > { %v410_v15 = vpop.f32.mrf.mxu0 }
  0xda   : > { %v3152_v16 = vpop.f32.mrf.mxu1 }
  0xdb   : > { %v2622_v17 = vpop.f32.mrf.mxu0 }
  0xdc   : > { %v2630_v18 = vpop.f32.mrf.mxu1 }
  0xdd   : > { %v415_v19 = vpop.f32.mrf.mxu0 }
  0xde   : > { %v505_v20 = vpop.f32.mrf.mxu1 }
  0xdf   : > { %v2625_v21 = vpop.f32.mrf.mxu0  ;;  %v534_v28 = vadd.f32 %v505_v20, %v407_v11 }
  0xe0   : > { %v2635_v22 = vpop.f32.mrf.mxu1 }
  0xe1   : > { %v418_v23 = vpop.f32.mrf.mxu0 }
  0xe2   : > { %v508_v24 = vpop.f32.mrf.mxu1 }
  0xe3   : > { %v2626_v25 = vpop.f32.mrf.mxu0  ;;  %v535_v36 = vadd.f32 %v508_v24, %v410_v15  ;;  %v848_v24 = vld [vmem:[#allocation2 + $0x8] sm:$0xf] }
  0xe4   : > { %v2636_v29 = vpop.f32.mrf.mxu1 }
  0xe5   : > { %v605_v30 = vpop.f32.mrf.mxu0 }
  0xe6   : > { %v513_v32 = vpop.f32.mrf.mxu1  ;;  %v634_v33 = vadd.f32 %v605_v30, %v534_v28 }
  0xe7   : > { %v2649_v35 = vpop.f32.mrf.mxu0  ;;  %v536_v45 = vadd.f32 %v513_v32, %v415_v19  ;;  %v678_v32 = vadd.s32 5, %v3158_v27 }
  0xe8   : > { %v659_v37 = vadd.f32 %v3163_v31, %v634_v33  ;;  %v2639_v38 = vpop.f32.mrf.mxu1 }
  0xe9   : > { %v608_v39 = vpop.f32.mrf.mxu0  ;;  %vm690_vm11 = vcmp.lt.s32.totalorder %v678_v32, 8 }
  0xea   : > { %v665_v41 = vmax.f32 %v659_v37, 0.0  ;;  %v516_v42 = vpop.f32.mrf.mxu1  ;;  %v635_v43 = vadd.f32 %v608_v39, %v535_v36 }
  0xeb   : > { %v2650_v44 = vpop.f32.mrf.mxu0  ;;  %v537_v58 = vadd.f32 %v516_v42, %v418_v23 }
  0xec   : > { %v709_v46 = vsel %vm691_vm10, %v665_v41, 0.0  ;;  %v660_v47 = vadd.f32 %v3163_v31, %v635_v43  ;;  %v2640_v48 = vpop.f32.mrf.mxu1  ;;  %v854_v44 = vld [vmem:[#allocation2 + $0x10] sm:$0xf]  ;;  %vm684_vm10 = vcmp.ge.s32.totalorder %v678_v32, 0  ;;  %v872_v32 = vld [vmem:[#allocation2 + $0x28] sm:$0xf] }
  0xed   : > { %v2470_v49 = vpack.c.bf16 %v709_v46, %v709_v46  ;;  %v613_v50 = vpop.f32.mrf.mxu0  ;;  %v857_v46 = vld [vmem:[#allocation2 + $0x14] sm:$0x1]  ;;  %vm696_vm12 = vmand %vm684_vm10, %vm690_vm11 }
  0xee   : > { %v666_v51 = vmax.f32 %v660_v47, 0.0  ;;  %v521_v52 = vpop.f32.mrf.mxu1  ;;  %v636_v53 = vadd.f32 %v613_v50, %v536_v45 }
  0xef   : > { %v781_v55 = vshrl.u32 %v2470_v49, 16  ;;  %v2653_v56 = vpop.f32.mrf.mxu0  ;;  %v784_v63 = vshll.u32 %v2470_v49, 16  ;;  %v538_v17 = vadd.f32 %v521_v52, %v3150_v12  ;;  %v851_v12 = vld [vmem:[#allocation2 + $0xc] sm:$0x1] }
  0xf0   : > { %v710_v59 = vsel %vm692_vm13, %v666_v51, 0.0  ;;  %v661_v60 = vadd.f32 %v3163_v31, %v636_v53  ;;  %v2643_v61 = vpop.f32.mrf.mxu1  ;;  %v860_v53 = vld [vmem:[#allocation2 + $0x18] sm:$0xf] }
  0xf1   : > { %v783_v62 = vrot.slane %v781_v55, 7  ;;  %v2471_v1 = vpack.c.bf16 %v710_v59, %v710_v59  ;;  %v616_v3 = vpop.f32.mrf.mxu0 }
  0xf2   : > { %v667_v6 = vmax.f32 %v661_v60, 0.0  ;;  %v524_v7 = vpop.f32.mrf.mxu1  ;;  %v637_v8 = vadd.f32 %v616_v3, %v537_v58 }
  0xf3   : > { %v786_v9 = vor.u32 %v784_v63, %v783_v62  ;;  %v787_v11 = vrot.slane %v783_v62, 4  ;;  %v789_v13 = vshrl.u32 %v2471_v1, 16  ;;  %v2654_v14 = vpop.f32.mrf.mxu0  ;;  %v792_v15 = vshll.u32 %v2471_v1, 16  ;;  %v863_v62 = vld [vmem:[#allocation2 + $0x1c] sm:$0x1] }
  0xf4   : > { %v711_v18 = vsel %vm3175_vm1, %v667_v6, 0.0  ;;  %v662_v19 = vadd.f32 %v3163_v31, %v637_v8  ;;  %v2644_v20 = vpop.f32.mrf.mxu1  ;;  %v539_v38 = vadd.f32 %v524_v7, %v3152_v16  ;;  %v866_v6 = vld [vmem:[#allocation2 + $0x20] sm:$0xf] }
  0xf5   : > { %v843_v21 = vsel %vm3180_vm2, %v786_v9, %v842_v0  ;;  %v846_v22 = vsel %vm3039_vm6, %v787_v11, %v845_v5  ;;  %v791_v23 = vrot.slane %v789_v13, 7  ;;  %v2472_v25 = vpack.c.bf16 %v711_v18, %v711_v18  ;;  %v621_v28 = vpop.f32.mrf.mxu0 }
  0xf6   : > { %844 = vst [vmem:[#allocation2] sm:$0xf] %v843_v21  ;;  %847 = vst [vmem:[#allocation2 + $0x4] sm:$0x1] %v846_v22  ;;  %v668_v29 = vmax.f32 %v662_v19, 0.0  ;;  %v638_v30 = vadd.f32 %v621_v28, %v538_v17 }
  0xf7   : > { %v794_v33 = vor.u32 %v792_v15, %v791_v23  ;;  %v795_v34 = vrot.slane %v791_v23, 4  ;;  %v797_v35 = vshrl.u32 %v2472_v25, 16  ;;  %v2657_v36 = vpop.f32.mrf.mxu0  ;;  %v800_v37 = vshll.u32 %v2472_v25, 16  ;;  %v869_v19 = vld [vmem:[#allocation2 + $0x24] sm:$0x1] }
  0xf8   : > { %v712_v39 = vsel %vm694_vm5, %v668_v29, 0.0  ;;  %v663_v40 = vadd.f32 %v3163_v31, %v638_v30 }
  0xf9   : > { %v849_v41 = vsel %vm3180_vm2, %v794_v33, %v848_v24  ;;  %v852_v42 = vsel %vm3039_vm6, %v795_v34, %v851_v12  ;;  %v799_v43 = vrot.slane %v797_v35, 7  ;;  %v2473_v45 = vpack.c.bf16 %v712_v39, %v712_v39  ;;  %v624_v27 = vpop.f32.mrf.mxu0  ;;  %v875_v33 = vld [vmem:[#allocation2 + $0x2c] sm:$0x1] }
  0xfa   : > { %850 = vst [vmem:[#allocation2 + $0x8] sm:$0xf] %v849_v41  ;;  %853 = vst [vmem:[#allocation2 + $0xc] sm:$0x1] %v852_v42  ;;  %v669_v16 = vmax.f32 %v663_v40, 0.0  ;;  %v639_v47 = vadd.f32 %v624_v27, %v539_v38 }
  0xfb   : > { %v802_v48 = vor.u32 %v800_v37, %v799_v43  ;;  %v803_v49 = vrot.slane %v799_v43, 4  ;;  %v805_v50 = vshrl.u32 %v2473_v45, 16  ;;  %v2658_v51 = vpop.f32.mrf.mxu0  ;;  %v808_v52 = vshll.u32 %v2473_v45, 16 }
  0xfc   : > { %v713_v54 = vsel %vm695_vm9, %v669_v16, 0.0  ;;  %v664_v55 = vadd.f32 %v3163_v31, %v639_v47 }
  0xfd   : > { %v855_v56 = vsel %vm3180_vm2, %v802_v48, %v854_v44  ;;  %v858_v57 = vsel %vm3039_vm6, %v803_v49, %v857_v46  ;;  %v807_v58 = vrot.slane %v805_v50, 7  ;;  %v2474_v59 = vpack.c.bf16 %v713_v54, %v713_v54  ;;  %v3208_v60 = vld [vmem:[#allocation2] sm:$0xf]  ;;  %v882_v61 = vld [vmem:[#allocation2 + $0x4] sm:$0x1] }
  0xfe   : > { %856 = vst [vmem:[#allocation2 + $0x10] sm:$0xf] %v855_v56  ;;  %859 = vst [vmem:[#allocation2 + $0x14] sm:$0x1] %v858_v57  ;;  %v670_v63 = vmax.f32 %v664_v55, 0.0  ;;  %v2253_v1 = vcombine.low %v3208_v60, %v882_v61 }
  0xff   : > { %v886_v0 = vld [vmem:[#allocation2] sm:$0xe]  ;;  %v810_v31 = vor.u32 %v808_v52, %v807_v58  ;;  %v811_v2 = vrot.slane %v807_v58, 4  ;;  %v813_v3 = vshrl.u32 %v2474_v59, 16  ;;  %v816_v5 = vshll.u32 %v2474_v59, 16 }
 0x100   : > { %v714_v7 = vsel %vm696_vm12, %v670_v63, 0.0  ;;  %v2257_v8 = vcombine.low %v886_v0, %v882_v61  ;;  %v913_v9 = vshll.u32 %v2253_v1, 16  ;;  %v911_v22 = vshrl.u32 %v2253_v1, 16  ;;  %v2806_v1 = vld [vmem:[%s3424_s4 + $0xf8] sm:$0xff]  }
 0x101   : > { %v861_v11 = vsel %vm3180_vm2, %v810_v31, %v860_v53  ;;  %v864_v13 = vsel %vm3039_vm6, %v811_v2, %v863_v62  ;;  %v815_v14 = vrot.slane %v813_v3, 7  ;;  %v2475_v15 = vpack.c.bf16 %v714_v7, %v714_v7  ;;  %v3215_v17 = vld [vmem:[#allocation2 + $0x8] sm:$0xf]  ;;  %v883_v18 = vld [vmem:[#allocation2 + $0xc] sm:$0x1]  ;;  %v2810_v3 = vld [vmem:[%s3424_s4 + $0x130] sm:$0xff]  }
 0x102   : > { %862 = vst [vmem:[#allocation2 + $0x18] sm:$0xf] %v861_v11  ;;  %865 = vst [vmem:[#allocation2 + $0x1c] sm:$0x1] %v864_v13  ;;  %v887_v20 = vld [vmem:[#allocation2 + $0x8] sm:$0xe]  ;;  %v2254_v21 = vcombine.low %v3215_v17, %v883_v18  ;;  %v2261_v26 = vcombine.low %v3208_v60, %v3215_v17 }
 0x103   : > { %v915_v23 = vrot.slane %v913_v9, 1  ;;  %v818_v24 = vor.u32 %v816_v5, %v815_v14  ;;  %v819_v25 = vrot.slane %v815_v14, 4  ;;  %v821_v28 = vshrl.u32 %v2475_v15, 16  ;;  %v3218_v29 = vld [vmem:[#allocation2 + $0x8] sm:$0xf]  ;;  %v2811_v60 = vld [vmem:[%s3424_s4 + $0xf0] sm:$0xff]  }
 0x104   : > { %v950_v12 = vrot.slane %v2257_v8, 1  ;;  %v824_v30 = vshll.u32 %v2475_v15, 16  ;;  %v2258_v34 = vcombine.low %v887_v20, %v883_v18  ;;  %v920_v35 = vshll.u32 %v2254_v21, 16  ;;  %v1273_v36 = vld [vmem:[#allocation2 + $0xc] sm:$0x1] }
 0x105   : > { %v1277_v37 = vld [vmem:[#allocation2 + $0x8] sm:$0xe]  ;;  %v867_v38 = vsel %vm3180_vm2, %v818_v24, %v866_v6  ;;  %v870_v39 = vsel %vm3039_vm6, %v819_v25, %v869_v19  ;;  %v823_v40 = vrot.slane %v821_v28, 7  ;;  %v918_v41 = vshrl.u32 %v2254_v21, 16  ;;  %v884_v42 = vld [vmem:[#allocation2 + $0x14] sm:$0x1] }
 0x106   : > { %v888_v43 = vld [vmem:[#allocation2 + $0x10] sm:$0xe]  ;;  %868 = vst [vmem:[#allocation2 + $0x20] sm:$0xf] %v867_v38  ;;  %871 = vst [vmem:[#allocation2 + $0x24] sm:$0x1] %v870_v39  ;;  %v916_v45 = vor.u32 %v915_v23, %v911_v22  ;;  %v2291_v51 = vcombine.low %v3218_v29, %v1273_v36  ;;  %v2295_v55 = vcombine.low %v1277_v37, %v1273_v36 }
 0x107   : > { %v951_v44 = vrot.slane %v2258_v34, 1  ;;  %v922_v27 = vrot.slane %v920_v35, 1  ;;  %v3224_v46 = vld [vmem:[#allocation2 + $0x10] sm:$0xf]  ;;  %v1274_v16 = vld [vmem:[#allocation2 + $0x14] sm:$0x1]  ;;  %v826_v47 = vor.u32 %v824_v30, %v823_v40  ;;  %v2259_v49 = vcombine.low %v888_v43, %v884_v42 }
 0x108   : > { %v827_v48 = vrot.slane %v823_v40, 4  ;;  %v1278_v50 = vld [vmem:[#allocation2 + $0x10] sm:$0xe]  ;;  %v2292_v62 = vcombine.low %v3224_v46, %v1274_v16  ;;  %v1341_v9 = vrot.slane %v2295_v55, 1  ;;  %v1304_v11 = vshll.u32 %v2291_v51, 16  ;;  %v2820_v24 = vld [vmem:[%s3424_s4 + $0x128] sm:$0xff]  }
 0x109   : > { %v3227_v52 = vld [vmem:[#allocation2 + $0x10] sm:$0xf]  ;;  %v2263_v53 = vcombine.low %v950_v12, %v951_v44  ;;  %v923_v54 = vor.u32 %v922_v27, %v918_v41  ;;  %v2296_v56 = vcombine.low %v1278_v50, %v1274_v16  ;;  %v873_v57 = vsel %vm3180_vm2, %v826_v47, %v872_v32  ;;  %v885_v59 = vld [vmem:[#allocation2 + $0x1c] sm:$0x1]  ;;  %v889_v61 = vld [vmem:[#allocation2 + $0x18] sm:$0xe] }
 0x10a   : > { %v876_v58 = vsel %vm3039_vm6, %v827_v48, %v875_v33  ;;  %v2255_v63 = vcombine.low %v3227_v52, %v884_v42  ;;  %874 = vst [vmem:[#allocation2 + $0x28] sm:$0xf] %v873_v57  ;;  %v2260_v31 = vcombine.low %v889_v61, %v885_v59  ;;  %v881_v2 = vld [vmem:[#allocation2 + $0x18] sm:$0xf]  ;;  %v952_v7 = vrot.slane %v2259_v49, 1  ;;  %v2817_v19 = vld [vmem:[%s3424_s4 + $0x170] sm:$0xff]  }
 0x10b   : > { %877 = vst [vmem:[#allocation2 + $0x2c] sm:$0x1] %v876_v58  ;;  %2675 = vmatprep.mubr.bf16.mxu0 %v2263_v53  ;;  %v2262_v0 = vcombine.low %v916_v45, %v923_v54  ;;  %v1342_v4 = vrot.slane %v2296_v56, 1  ;;  %v2256_v5 = vcombine.low %v881_v2, %v885_v59  ;;  %v1311_v15 = vshll.u32 %v2292_v62, 16  ;;  %v2823_v34 = vld [vmem:[%s3424_s4 + $0x168] sm:$0xff]   ;;  %v2824_v38 = vld [vmem:[%s3424_s4 + $0x120] sm:$0xff]  }
 0x10c   : > { %v927_v6 = vshll.u32 %v2255_v63, 16  ;;  %v953_v8 = vrot.slane %v2260_v31, 1  ;;  %v925_v20 = vshrl.u32 %v2255_v63, 16  ;;  %v1309_v21 = vshrl.u32 %v2292_v62, 16  ;;  %v2822_v36 = vld [vmem:[%s3424_s4 + $0xe8] sm:$0xff]   ;;  %v2826_v40 = vld [vmem:[%s3424_s4 + $0x160] sm:$0xff]  }
 0x10d   : > { %1198 = vmatprep.mubr.bf16.mxu1 %v2262_v0  ;;  %v934_v14 = vshll.u32 %v2256_v5, 16  ;;  %v2349_v17 = vcombine.low %v1341_v9, %v1342_v4  ;;  %v932_v22 = vshrl.u32 %v2256_v5, 16  ;;  %v1306_v25 = vrot.slane %v1304_v11, 1  ;;  %v2825_v41 = vld [vmem:[%s3424_s4 + $0xe0] sm:$0xff]   ;;  %v2827_v42 = vld [vmem:[%s3424_s4 + $0x118] sm:$0xff]   ;;  %v2830_v16 = vld [vmem:[%s3424_s4 + $0x110] sm:$0xff]  }
 0x10e   : > { %1199 = vmatmul.mubr.bf16.vlgmr.msra.gmra.mxu1 %v2261_v26  ;;  %v929_v13 = vrot.slane %v927_v6, 1  ;;  %v2266_v18 = vcombine.low %v952_v7, %v953_v8  ;;  %v1313_v28 = vrot.slane %v1311_v15, 1  ;;  %v1302_v32 = vshrl.u32 %v2291_v51, 16  ;;  %v2829_v43 = vld [vmem:[%s3424_s4 + $0x158] sm:$0xff]   ;;  %v3275_v44 = vld [vmem:[#allocation2 + $0x20] sm:$0xf] }
 0x10f   : > { %2542 = vmatpush3.bf16.msra.mxu1 %v2806_v1  ;;  %v936_v23 = vrot.slane %v934_v14, 1  ;;  %v1276_v45 = vld [vmem:[#allocation2 + $0x24] sm:$0x1]  ;;  %v2828_v27 = vld [vmem:[%s3424_s4 + $0xd8] sm:$0xff]   ;;  %v2832_v50 = vld [vmem:[%s3424_s4 + $0x150] sm:$0xff]  }
 0x110   : > { %2543 = vmatprep.subr.bf16.mxu1 %v2810_v3  ;;  %2676 = vmatmul.mubr.bf16.vlgmr.msra.gmra.mxu0 %v2266_v18  ;;  %v930_v12 = vor.u32 %v929_v13, %v925_v20  ;;  %v1314_v33 = vor.u32 %v1313_v28, %v1309_v21  ;;  %v1307_v37 = vor.u32 %v1306_v25, %v1302_v32  ;;  %v3283_v47 = vld [vmem:[#allocation2 + $0x18] sm:$0xf]  ;;  %v1275_v48 = vld [vmem:[#allocation2 + $0x1c] sm:$0x1]  ;;  %v2831_v51 = vld [vmem:[%s3424_s4 + $0xd0] sm:$0xff]  }
 0x111   : > { %2680 = vmatpush3.bf16.msra.mxu0 %v3147_v10  ;;  %2695 = vmatprep.mubr.bf16.mxu0 %v2349_v17  ;;  %v937_v30 = vor.u32 %v936_v23, %v932_v22  ;;  %v2264_v10 = vcombine.low %v3227_v52, %v881_v2  ;;  %v2294_v49 = vcombine.low %v3275_v44, %v1276_v45  ;;  %v2833_v53 = vld [vmem:[%s3424_s4 + $0x108] sm:$0xff]   ;;  %v3299_v56 = vld [vmem:[#allocation2 + $0x18] sm:$0xf]  ;;  %v1674_v57 = vld [vmem:[#allocation2 + $0x1c] sm:$0x1] }
 0x112   : > { %2681 = vmatprep.subr.bf16.mxu0 %v2817_v19  ;;  %v2348_v39 = vcombine.low %v1307_v37, %v1314_v33  ;;  %v2293_v52 = vcombine.low %v3283_v47, %v1275_v48  ;;  %v2835_v55 = vld [vmem:[%s3424_s4 + $0x148] sm:$0xff]   ;;  %v2836_v59 = vld [vmem:[%s3424_s4 + $0x100] sm:$0xff]   ;;  %v3307_v63 = vld [vmem:[#allocation2 + $0x10] sm:$0xf]  ;;  %v2378_v2 = vcombine.low %v3299_v56, %v1674_v57  ;;  %v2347_v25 = vcombine.low %v3218_v29, %v3224_v46 }
 0x113   : > { %2544 = vmatpush3.bf16.msra.mxu1 %v2811_v60  ;;  %v2265_v35 = vcombine.low %v930_v12, %v937_v30  ;;  %v1325_v54 = vshll.u32 %v2294_v49, 16  ;;  %v2834_v58 = vld [vmem:[%s3424_s4 + $0xc8] sm:$0xff]   ;;  %v1280_v62 = vld [vmem:[#allocation2 + $0x20] sm:$0xe]  ;;  %v1673_v0 = vld [vmem:[#allocation2 + $0x14] sm:$0x1] }
 0x114   : > { %2545 = vmatprep.subr.bf16.mxu1 %v2820_v24  ;;  %v1318_v61 = vshll.u32 %v2293_v52, 16  ;;  %v1678_v1 = vld [vmem:[#allocation2 + $0x18] sm:$0xe]  ;;  %v2838_v26 = vld [vmem:[%s3424_s4 + $0x140] sm:$0xff]   ;;  %v2298_v3 = vcombine.low %v1280_v62, %v1276_v45  ;;  %v1677_v5 = vld [vmem:[#allocation2 + $0x10] sm:$0xe]  ;;  %v2377_v9 = vcombine.low %v3307_v63, %v1673_v0 }
 0x115   : > { %1206 = vmatprep.mubr.bf16.mxu1 %v2265_v35  ;;  %2682 = vmatpush3.bf16.msra.mxu0 %v2817_v19  ;;  %v1327_v31 = vrot.slane %v1325_v54, 1  ;;  %v1279_v4 = vld [vmem:[#allocation2 + $0x18] sm:$0xe]  ;;  %v2837_v6 = vld [vmem:[%s3424_s4 + $0xc0] sm:$0xff]   ;;  %v1323_v8 = vshrl.u32 %v2294_v49, 16  ;;  %v2382_v11 = vcombine.low %v1678_v1, %v1674_v57  ;;  %v1316_v15 = vshrl.u32 %v2293_v52, 16 }
 0x116   : > { %1207 = vmatmul.mubr.bf16.gmra.mxu1 %v2264_v10  ;;  %2683 = vmatprep.subr.bf16.mxu0 %v2823_v34  ;;  %v1320_v7 = vrot.slane %v1318_v61, 1  ;;  %v2839_v13 = vld [vmem:[%s3424_s4 + $0x1f8] sm:$0xff]   ;;  %v2297_v14 = vcombine.low %v1279_v4, %v1275_v48  ;;  %v2381_v60 = vcombine.low %v1677_v5, %v1673_v0  ;;  %v1711_v17 = vshll.u32 %v2378_v2, 16  ;;  %v2846_v12 = vld [vmem:[%s3424_s4 + $0x1f0] sm:$0xff]   ;;  %v2855_v10 = vld [vmem:[%s3424_s4 + $0x1e8] sm:$0xff]  }
 0x117   : > { %2546 = vmatpush3.bf16.msra.mxu1 %v2822_v36  ;;  %1590 = vmatprep.mubr.bf16.mxu1 %v2348_v39  ;;  %v1328_v18 = vor.u32 %v1327_v31, %v1323_v8  ;;  %v1344_v19 = vrot.slane %v2298_v3, 1  ;;  %v2845_v20 = vld [vmem:[%s3424_s4 + $0x238] sm:$0xff]   ;;  %v1742_v23 = vrot.slane %v2382_v11, 1  ;;  %v1704_v24 = vshll.u32 %v2377_v9, 16  ;;  %v2853_v35 = vld [vmem:[%s3424_s4 + $0x230] sm:$0xff]   ;;  %v2858_v45 = vld [vmem:[%s3424_s4 + $0x1e0] sm:$0xff]  }
 0x118   : > { %2547 = vmatprep.subr.bf16.mxu1 %v2824_v38  ;;  %v1321_v21 = vor.u32 %v1320_v7, %v1316_v15  ;;  %v2842_v22 = vld [vmem:[%s3424_s4 + $0x1b8] sm:$0xff]   ;;  %v1343_v28 = vrot.slane %v2297_v14, 1  ;;  %v1741_v32 = vrot.slane %v2381_v60, 1  ;;  %v1713_v33 = vrot.slane %v1711_v17, 1  ;;  %v2852_v46 = vld [vmem:[%s3424_s4 + $0x1b0] sm:$0xff]   ;;  %v2859_v48 = vld [vmem:[%s3424_s4 + $0x1a0] sm:$0xff]  }
 0x119   : > { %2684 = vmatpush3.bf16.msra.mxu0 %v2823_v34  ;;  %v1706_v36 = vrot.slane %v1704_v24, 1  ;;  %v1709_v37 = vshrl.u32 %v2378_v2, 16  ;;  %v1702_v38 = vshrl.u32 %v2377_v9, 16  ;;  %v1672_v49 = vld [vmem:[#allocation2 + $0x28] sm:$0xf]  ;;  %v2864_v52 = vld [vmem:[%s3424_s4 + $0x1d0] sm:$0xff]   ;;  %v2433_v60 = vcombine.low %v3307_v63, %v3299_v56 }
 0x11a   : > { %2685 = vmatprep.subr.bf16.mxu0 %v2826_v40  ;;  %v2351_v30 = vcombine.low %v1321_v21, %v1328_v18  ;;  %v2352_v34 = vcombine.low %v1343_v28, %v1344_v19  ;;  %v2435_v29 = vcombine.low %v1741_v32, %v1742_v23  ;;  %v1675_v54 = vld [vmem:[#allocation2 + $0x24] sm:$0x1]  ;;  %v2866_v57 = vld [vmem:[%s3424_s4 + $0x210] sm:$0xff]   ;;  %v2867_v61 = vld [vmem:[%s3424_s4 + $0x1c8] sm:$0xff]  }
 0x11b   : > { %2548 = vmatpush3.bf16.msra.mxu1 %v2825_v41  ;;  %v1714_v39 = vor.u32 %v1713_v33, %v1709_v37  ;;  %v2856_v41 = vld [vmem:[%s3424_s4 + $0x1a8] sm:$0xff]   ;;  %v2870_v2 = vld [vmem:[%s3424_s4 + $0x1c0] sm:$0xff]  }
 0x11c   : > { %2549 = vmatprep.subr.bf16.mxu1 %v2827_v42  ;;  %v1707_v42 = vor.u32 %v1706_v36, %v1702_v38  ;;  %v2869_v0 = vld [vmem:[%s3424_s4 + $0x208] sm:$0xff]   ;;  %v1679_v3 = vld [vmem:[#allocation2 + $0x20] sm:$0xe] }
 0x11d   : > { %2686 = vmatpush3.bf16.msra.mxu0 %v2826_v40  ;;  %v2857_v40 = vld [vmem:[%s3424_s4 + $0x228] sm:$0xff]   ;;  %v2872_v5 = vld [vmem:[%s3424_s4 + $0x200] sm:$0xff]   ;;  %v2383_v11 = vcombine.low %v1679_v3, %v1675_v54 }
 0x11e   : > { %2687 = vmatprep.subr.bf16.mxu0 %v2829_v43  ;;  %v2868_v1 = vld [vmem:[%s3424_s4 + $0x188] sm:$0xff]   ;;  %v2871_v7 = vld [vmem:[%s3424_s4 + $0x180] sm:$0xff]  }
 0x11f   : > { %2550 = vmatpush3.bf16.msra.mxu1 %v2828_v27  ;;  %v2434_v27 = vcombine.low %v1707_v42, %v1714_v39  ;;  %v1680_v4 = vld [vmem:[#allocation2 + $0x28] sm:$0xe]  ;;  %v1743_v17 = vrot.slane %v2383_v11, 1 }
 0x120   : > { %2551 = vmatprep.subr.bf16.mxu1 %v2830_v16  ;;  %v2860_v16 = vld [vmem:[%s3424_s4 + $0x220] sm:$0xff]  }
 0x121   : > { %2688 = vmatpush3.bf16.msra.mxu0 %v2829_v43  ;;  %v2350_v43 = vcombine.low %v3283_v47, %v3275_v44  ;;  %v2861_v44 = vld [vmem:[%s3424_s4 + $0x1d8] sm:$0xff]  }
 0x122   : > { %2689 = vmatprep.subr.bf16.mxu0 %v2832_v50  ;;  %v2863_v47 = vld [vmem:[%s3424_s4 + $0x218] sm:$0xff]  }
 0x123   : > { %2552 = vmatpush3.bf16.msra.mxu1 %v2831_v51  ;;  %v2862_v51 = vld [vmem:[%s3424_s4 + $0x198] sm:$0xff]  }
 0x124   : > { %2553 = vmatprep.subr.bf16.mxu1 %v2833_v53  ;;  %v1671_v53 = vld [vmem:[#allocation2 + $0x20] sm:$0xf] }
 0x125   : > { %2690 = vmatpush3.bf16.msra.mxu0 %v2832_v50  ;;  %v1676_v50 = vld [vmem:[#allocation2 + $0x2c] sm:$0x1]  ;;  %v2436_v21 = vcombine.low %v1671_v53, %v1672_v49 }
 0x126   : > { %2691 = vmatprep.subr.bf16.mxu0 %v2835_v55 }
 0x127   : > { %2554 = vmatpush3.bf16.msra.mxu1 %v2834_v58  ;;  %v2865_v58 = vld [vmem:[%s3424_s4 + $0x190] sm:$0xff]  }
 0x128   : > { %2555 = vmatprep.subr.bf16.mxu1 %v2836_v59  ;;  %v2379_v59 = vcombine.low %v1671_v53, %v1675_v54 }
 0x129   : > { %2692 = vmatpush3.bf16.msra.mxu0 %v2835_v55  ;;  %v2380_v55 = vcombine.low %v1672_v49, %v1676_v50 }
 0x12a   : > { %2693 = vmatprep.subr.bf16.mxu0 %v2838_v26  ;;  %v1718_v31 = vshll.u32 %v2379_v59, 16 }
 0x12b   : > { %2556 = vmatpush3.bf16.msra.mxu1 %v2837_v6  ;;  %v1725_v62 = vshll.u32 %v2380_v55, 16  ;;  %v2384_v6 = vcombine.low %v1680_v4, %v1676_v50  ;;  %v1723_v9 = vshrl.u32 %v2380_v55, 16 }
 0x12c   : > { %2579 = vmatprep.subr.bf16.mxu1 %v2839_v13  ;;  %v1720_v8 = vrot.slane %v1718_v31, 1  ;;  %v1716_v13 = vshrl.u32 %v2379_v59, 16 }
 0x12d   : > { %2694 = vmatpush3.bf16.msra.mxu0 %v2838_v26  ;;  %v1727_v26 = vrot.slane %v1725_v62, 1  ;;  %v1744_v15 = vrot.slane %v2384_v6, 1 }
 0x12e   : > { %1591 = vmatmul.mubr.bf16.vlgmr.msra.gmra.mxu1 %v2347_v25  ;;  %2699 = vmatprep.subr.bf16.mxu0 %v2845_v20  ;;  %v1721_v18 = vor.u32 %v1720_v8, %v1716_v13 }
 0x12f   : > { %1598 = vmatprep.mubr.bf16.mxu1 %v2351_v30  ;;  %2580 = vmatpush3.bf16.msra.mxu1 %v2842_v22  ;;  %v1728_v14 = vor.u32 %v1727_v26, %v1723_v9 }
 0x130   : > { %2696 = vmatmul.mubr.bf16.vlgmr.msra.gmra.mxu0 %v2352_v34  ;;  %2581 = vmatprep.subr.bf16.mxu1 %v2846_v12 }
 0x131   : > { %2700 = vmatpush3.bf16.msra.mxu0 %v2845_v20  ;;  %2715 = vmatprep.mubr.bf16.mxu0 %v2435_v29  ;;  %v2437_v19 = vcombine.low %v1721_v18, %v1728_v14  ;;  %v2438_v20 = vcombine.low %v1743_v17, %v1744_v15 }
 0x132   : > { %2701 = vmatprep.subr.bf16.mxu0 %v2853_v35 }
 0x133   : > { %2582 = vmatpush3.bf16.msra.mxu1 %v2852_v46 }
 0x134   : > { %2583 = vmatprep.subr.bf16.mxu1 %v2855_v10 }
 0x135   : > { %2702 = vmatpush3.bf16.msra.mxu0 %v2853_v35 }
 0x136   : > { %1599 = vmatmul.mubr.bf16.gmra.mxu1 %v2350_v43  ;;  %2703 = vmatprep.subr.bf16.mxu0 %v2857_v40 }
 0x137   : > { %2584 = vmatpush3.bf16.msra.mxu1 %v2856_v41  ;;  %1990 = vmatprep.mubr.bf16.mxu1 %v2434_v27 }
 0x138   : > { %2585 = vmatprep.subr.bf16.mxu1 %v2858_v45 }
 0x139   : > { %2704 = vmatpush3.bf16.msra.mxu0 %v2857_v40 }
 0x13a   : > { %2705 = vmatprep.subr.bf16.mxu0 %v2860_v16 }
 0x13b   : > { %2586 = vmatpush3.bf16.msra.mxu1 %v2859_v48 }
 0x13c   : > { %2587 = vmatprep.subr.bf16.mxu1 %v2861_v44 }
 0x13d   : > { %2706 = vmatpush3.bf16.msra.mxu0 %v2860_v16 }
 0x13e   : > { %2707 = vmatprep.subr.bf16.mxu0 %v2863_v47 }
 0x13f   : > { %2588 = vmatpush3.bf16.msra.mxu1 %v2862_v51 }
 0x140   : > { %2589 = vmatprep.subr.bf16.mxu1 %v2864_v52 }
 0x141   : > { %2708 = vmatpush3.bf16.msra.mxu0 %v2863_v47 }
 0x142   : > { %2709 = vmatprep.subr.bf16.mxu0 %v2866_v57 }
 0x143   : > { %2590 = vmatpush3.bf16.msra.mxu1 %v2865_v58 }
 0x144   : > { %2591 = vmatprep.subr.bf16.mxu1 %v2867_v61 }
 0x145   : > { %2710 = vmatpush3.bf16.msra.mxu0 %v2866_v57 }
 0x146   : > { %2711 = vmatprep.subr.bf16.mxu0 %v2869_v0 }
 0x147   : > { %2592 = vmatpush3.bf16.msra.mxu1 %v2868_v1 }
 0x148   : > { %2593 = vmatprep.subr.bf16.mxu1 %v2870_v2  ;;  %v2463_v2 = vld [vmem:[%s3425_s5] ss:$0 sm:$0xff] }
 0x149   : > { %2712 = vmatpush3.bf16.msra.mxu0 %v2869_v0 }
 0x14a   : > { %2713 = vmatprep.subr.bf16.mxu0 %v2872_v5 }
 0x14b   : > { %2594 = vmatpush3.bf16.msra.mxu1 %v2871_v7 }
 0x14d   : > { %2714 = vmatpush3.bf16.msra.mxu0 %v2872_v5 }
 0x14e   : > { %1991 = vmatmul.mubr.bf16.vlgmr.msra.gmra.mxu1 %v2433_v60 }
 0x14f   : > { %1998 = vmatprep.mubr.bf16.mxu1 %v2437_v19 }
 0x150   : > { %2716 = vmatmul.mubr.bf16.vlgmr.msra.gmra.mxu0 %v2438_v20 }
 0x156   : > { %1999 = vmatmul.mubr.bf16.gmra.mxu1 %v2436_v21 }
 0x1ce   : > { %v2519_v22 = vpop.f32.mrf.mxu1 }
 0x1d0   : > { %v2520_v23 = vpop.f32.mrf.mxu1  ;;  %v2677_v34 = vpop.f32.mrf.mxu0 }
 0x1d1   : > { %v2521_v45 = vadd.f32 %v2520_v23, %v2519_v22 }
 0x1d2   : > { %v2522_v24 = vpop.f32.mrf.mxu1  ;;  %v1249_v63 = vpop.f32.mrf.mxu0 }
 0x1d3   : > { %v1250_v50 = vadd.f32 %v2521_v45, %v1249_v63 }
 0x1d4   : > { %v2523_v25 = vpop.f32.mrf.mxu1  ;;  %v2678_v29 = vpop.f32.mrf.mxu0 }
 0x1d5   : > { %v2524_v51 = vadd.f32 %v2523_v25, %v2522_v24 }
 0x1d6   : > { %v2525_v28 = vpop.f32.mrf.mxu1  ;;  %v1252_v36 = vpop.f32.mrf.mxu0 }
 0x1d7   : > { %v1253_v0 = vadd.f32 %v2524_v51, %v1252_v36 }
 0x1d8   : > { %v2526_v12 = vpop.f32.mrf.mxu1 }
 0x1d9   : > { %v2527_v1 = vadd.f32 %v2526_v12, %v2525_v28 }
 0x1da   : > { %v2528_v30 = vpop.f32.mrf.mxu1 }
 0x1db   : > { %v1258_v13 = vadd.f32 %v2677_v34, %v2527_v1 }
 0x1dc   : > { %v2529_v32 = vpop.f32.mrf.mxu1 }
 0x1dd   : > { %v2530_v9 = vadd.f32 %v2529_v32, %v2528_v30 }
 0x1df   : > { %v1261_v22 = vadd.f32 %v2678_v29, %v2530_v9 }
 0x1ee   : > { %v2557_v33 = vpop.f32.mrf.mxu1 }
 0x1f0   : > { %v2558_v56 = vpop.f32.mrf.mxu1  ;;  %v2697_v10 = vpop.f32.mrf.mxu0 }
 0x1f1   : > { %v2559_v42 = vadd.f32 %v2558_v56, %v2557_v33 }
 0x1f2   : > { %v2560_v35 = vpop.f32.mrf.mxu1  ;;  %v1641_v39 = vpop.f32.mrf.mxu0 }
 0x1f3   : > { %v1642_v48 = vadd.f32 %v2559_v42, %v1641_v39 }
 0x1f4   : > { %v2561_v46 = vpop.f32.mrf.mxu1  ;;  %v2698_v41 = vpop.f32.mrf.mxu0 }
 0x1f5   : > { %v2562_v44 = vadd.f32 %v2561_v46, %v2560_v35  ;;  %v1660_v55 = vadd.f32 %v1642_v48, %v1250_v50 }
 0x1f6   : > { %v2563_v37 = vpop.f32.mrf.mxu1  ;;  %v1644_v27 = vpop.f32.mrf.mxu0 }
 0x1f7   : > { %v1645_v57 = vadd.f32 %v2562_v44, %v1644_v27 }
 0x1f8   : > { %v2564_v38 = vpop.f32.mrf.mxu1 }
 0x1f9   : > { %v2565_v58 = vadd.f32 %v2564_v38, %v2563_v37  ;;  %v1661_v5 = vadd.f32 %v1645_v57, %v1253_v0 }
 0x1fa   : > { %v2566_v40 = vpop.f32.mrf.mxu1 }
 0x1fb   : > { %v1650_v6 = vadd.f32 %v2697_v10, %v2565_v58 }
 0x1fc   : > { %v2567_v43 = vpop.f32.mrf.mxu1 }
 0x1fd   : > { %v2568_v7 = vadd.f32 %v2567_v43, %v2566_v40  ;;  %v1662_v17 = vadd.f32 %v1650_v6, %v1258_v13 }
 0x1ff   : > { %v1653_v19 = vadd.f32 %v2698_v41, %v2568_v7 }
 0x201   : > { %v1663_v30 = vadd.f32 %v1653_v19, %v1261_v22 }
 0x20e   : > { %v2595_v16 = vpop.f32.mrf.mxu1 }
 0x210   : > { %v2596_v47 = vpop.f32.mrf.mxu1  ;;  %v2717_v49 = vpop.f32.mrf.mxu0 }
 0x211   : > { %v2597_v52 = vadd.f32 %v2596_v47, %v2595_v16 }
 0x212   : > { %v2598_v53 = vpop.f32.mrf.mxu1  ;;  %v2041_v54 = vpop.f32.mrf.mxu0 }
 0x213   : > { %v2042_v59 = vadd.f32 %v2597_v52, %v2041_v54 }
 0x214   : > { %v2599_v61 = vpop.f32.mrf.mxu1  ;;  %v2718_v62 = vpop.f32.mrf.mxu0 }
 0x215   : > { %v2060_v31 = vadd.f32 %v2042_v59, %v1660_v55  ;;  %v2600_v4 = vadd.f32 %v2599_v61, %v2598_v53 }
 0x216   : > { %v2601_v26 = vpop.f32.mrf.mxu1  ;;  %v2044_v3 = vpop.f32.mrf.mxu0 }
 0x217   : > { %v2045_v8 = vadd.f32 %v2600_v4, %v2044_v3  ;;  %v2079_v14 = vadd.f32 %v2463_v2, %v2060_v31 }
 0x218   : > { %v2602_v11 = vpop.f32.mrf.mxu1 }
 0x219   : > { %v2061_v15 = vadd.f32 %v2045_v8, %v1661_v5  ;;  %v2603_v18 = vadd.f32 %v2602_v11, %v2601_v26  ;;  %v2083_v24 = vmax.f32 %v2079_v14, 0.0 }
 0x21a   : > { %v2604_v60 = vpop.f32.mrf.mxu1 }
 0x21b   : > { %v2080_v20 = vadd.f32 %v2463_v2, %v2061_v15  ;;  %v2050_v21 = vadd.f32 %v2717_v49, %v2603_v18 }
 0x21c   : > { %v2605_v23 = vpop.f32.mrf.mxu1 }
 0x21d   : > { %v2084_v25 = vmax.f32 %v2080_v20, 0.0  ;;  %v2062_v28 = vadd.f32 %v2050_v21, %v1662_v17  ;;  %v2606_v12 = vadd.f32 %v2605_v23, %v2604_v60 }
 0x21f   : > { %v2483_v32 = vpack.c.bf16 %v2084_v25, %v2083_v24  ;;  %v2053_v33 = vadd.f32 %v2718_v62, %v2606_v12  ;;  %v2081_v34 = vadd.f32 %v2463_v2, %v2062_v28 }
 0x221   : > { %2484 = vst [vmem:[%s321_s20] sm:$0xff] %v2483_v32   ;;  %v2063_v56 = vadd.f32 %v2053_v33, %v1663_v30  ;;  %v2085_v35 = vmax.f32 %v2081_v34, 0.0 }
 0x223   : > { %v2082_v63 = vadd.f32 %v2463_v2, %v2063_v56 }
 0x225   : > { %v2086_v46 = vmax.f32 %v2082_v63, 0.0 }
 0x227   : > { %v2488_v36 = vpack.c.bf16 %v2086_v46, %v2085_v35 }
 0x229   : > { %2490 = vst [vmem:[%s321_s20 + $0x8] sm:$0xff] %v2488_v36  }
 0x22a PF: > { %s16_s25 = sadd.s32 1, %s2916_s25   ;;  %s3435_s21 = smov %s2908_s23 }
 0x22b   : > { %p13_p8 = scmp.ge.s32.totalorder %s16_s25, 6   ;;  %s3436_s22 = smov %s2912_s24 }
 0x22c   : > { %s3437_s23 = smov %s3440_s26  ;;  %s3438_s24 = smov %s3444_s27 }
 0x22d   :  { %15 = sbr.rel (!%p13_p8) target bundleno = 3 (0x3), region = 83 }

</bundles_post_ra>
